<compile_context>
chip_gen: v7x
topology: tpu7x:2x2x1
jax: 0.10.0
libtpu: 0.0.40
codegen_flags: <defaults>
</compile_context>

<pallas_src>
import functools

import jax
import jax.numpy as jnp
from jax.experimental import pallas as pl
from jax.experimental.pallas import tpu as pltpu

LANE = 128


def _round_up(v, m):
    return ((v + m - 1) // m) * m


def _pad_to(a, shape):
    return jnp.pad(a, [(0, t - s) for s, t in zip(a.shape, shape)])


# ----------------------------------- kernels -----------------------------------------------

def _gc_relu_kernel(adj_ref, feat_ref, w_ref, b_ref, out_ref):
    """out_rows = relu( (adj_rows @ feat) @ W + b ); bf16 MXU operands, f32 accumulation."""
    agg = jnp.dot(adj_ref[...], feat_ref[...], preferred_element_type=jnp.float32)
    z = jnp.dot(agg.astype(jnp.bfloat16), w_ref[...], preferred_element_type=jnp.float32)
    z = z + b_ref[...]
    out_ref[...] = jnp.maximum(z, 0.0).astype(out_ref.dtype)


def _gc_groupnorm_res_kernel(adj_ref, feat_ref, w_ref, b_ref, grp_ref, grp_t_ref,
                             gamma_ref, beta_ref, out_ref, *, row_tile, group_size, eps):
    """out_rows = GroupNorm(relu((adj_rows @ feat) @ W + b)) + feat_rows (residual)."""
    agg = jnp.dot(adj_ref[...], feat_ref[...], preferred_element_type=jnp.float32)
    z = jnp.dot(agg.astype(jnp.bfloat16), w_ref[...], preferred_element_type=jnp.float32)
    z = jnp.maximum(z + b_ref[...], 0.0)                              # f32 [tm, H_pad]

    # GroupNorm over channels, per node, via one-hot group matmuls (exact sums in f32;
    # avoids a reshape to a tiny trailing dim).  Padded channels land in all-zero phantom
    # groups and stay exactly zero.
    g = grp_ref[...]                                                  # [H_pad, G_pad]
    gt = grp_t_ref[...]                                               # [G_pad, H_pad]
    inv_gs = jnp.float32(1.0 / group_size)
    mean_g = jnp.dot(z, g, preferred_element_type=jnp.float32) * inv_gs
    mean_c = jnp.dot(mean_g, gt, preferred_element_type=jnp.float32)
    dev = z - mean_c
    var_g = jnp.dot(dev * dev, g, preferred_element_type=jnp.float32) * inv_gs
    var_c = jnp.dot(var_g, gt, preferred_element_type=jnp.float32)
    y = dev * jax.lax.rsqrt(var_c + eps)
    y = y * gamma_ref[...] + beta_ref[...]

    # Residual: same rows of the (resident) gc1 activation.
    r0 = pl.multiple_of(pl.program_id(0) * row_tile, row_tile)
    y = y + feat_ref[pl.ds(r0, row_tile), :].astype(jnp.float32)
    out_ref[...] = y.astype(out_ref.dtype)


def _gc_logsoftmax_kernel(adj_ref, feat_ref, w_ref, b_ref, out_ref, *, nclass):
    """out_rows = log_softmax( (adj_rows @ feat) @ W + b ) over the (masked) class axis."""
    agg = jnp.dot(adj_ref[...], feat_ref[...], preferred_element_type=jnp.float32)
    logits = jnp.dot(agg.astype(jnp.bfloat16), w_ref[...], preferred_element_type=jnp.float32)
    logits = logits + b_ref[...]
    col = jax.lax.broadcasted_iota(jnp.int32, logits.shape, 1)
    masked = jnp.where(col < nclass, logits, -1e30)                   # ignore padded class lanes
    m = jnp.max(masked, axis=1, keepdims=True)
    shifted = masked - m
    lse = jnp.log(jnp.sum(jnp.exp(shifted), axis=1, keepdims=True))
    out_ref[...] = (shifted - lse).astype(out_ref.dtype)


# ----------------------------------- wrapper ------------------------------------------------

def _row_spec(rows, cols):
    return pl.BlockSpec((rows, cols), lambda i: (i, 0))


def _full_spec(arr):
    return pl.BlockSpec(arr.shape, lambda i: (0, 0))


def _vmem_limit_bytes(tm, n_pad, max_cols):
    est = (2 * tm * n_pad * 2            # double-buffered adjacency row tiles (bf16)
           + 2 * n_pad * max_cols * 2    # resident node-feature operand (bf16)
           + 2 * tm * max_cols * 4       # double-buffered output tiles (f32 upper bound)
           + 8 * max_cols * max_cols * 4 # weights / group matrices / biases
           + (4 << 20))                  # headroom
    return int(min(max(est, 32 << 20), 64 << 20))   # explicit, and safe for v7x's 64 MiB VMEM


def _prepare_operands(x, adj, w1, b1, w2, b2, gamma, beta, w3, b3, *, num_groups, row_tile):
    n, nfeat = x.shape
    nhid = w1.shape[1]
    nclass = w3.shape[1]
    assert nhid % num_groups == 0, "GroupNorm requires nhid % num_groups == 0"
    gs = nhid // num_groups

    tm = max(16, (min(row_tile, _round_up(n, LANE)) // 16) * 16)
    n_pad = _round_up(_round_up(n, LANE), tm)
    f_pad = _round_up(nfeat, LANE)
    h_pad = _round_up(nhid, LANE)
    c_pad = _round_up(nclass, LANE)
    g_pad = _round_up(-(-h_pad // gs), LANE)

    bf16, f32 = jnp.bfloat16, jnp.float32
    # One-hot channel -> group matrix (padded channels fall into all-zero phantom groups).
    grp_of = jnp.arange(h_pad, dtype=jnp.int32) // gs
    grp = (grp_of[:, None] == jnp.arange(g_pad, dtype=jnp.int32)[None, :]).astype(f32)

    return dict(
        n=n, nclass=nclass, gs=gs, tm=tm,
        n_pad=n_pad, f_pad=f_pad, h_pad=h_pad, c_pad=c_pad, g_pad=g_pad,
        adj=_pad_to(adj, (n_pad, n_pad)).astype(bf16),
        x=_pad_to(x, (n_pad, f_pad)).astype(bf16),
        w1=_pad_to(w1, (f_pad, h_pad)).astype(bf16),
        b1=_pad_to(b1.reshape(1, -1), (1, h_pad)).astype(f32),
        w2=_pad_to(w2, (h_pad, h_pad)).astype(bf16),
        b2=_pad_to(b2.reshape(1, -1), (1, h_pad)).astype(f32),
        w3=_pad_to(w3, (h_pad, c_pad)).astype(bf16),
        b3=_pad_to(b3.reshape(1, -1), (1, c_pad)).astype(f32),
        gamma=_pad_to(gamma.reshape(1, -1), (1, h_pad)).astype(f32),
        beta=_pad_to(beta.reshape(1, -1), (1, h_pad)).astype(f32),
        grp=grp, grp_t=grp.T,
    )


def _forward_padded_pallas(ops, eps):
    tm, n_pad = ops["tm"], ops["n_pad"]
    f_pad, h_pad, c_pad, g_pad = ops["f_pad"], ops["h_pad"], ops["c_pad"], ops["g_pad"]
    grid = (n_pad // tm,)
    vmem_limit = _vmem_limit_bytes(tm, n_pad, max(f_pad, h_pad, c_pad, g_pad))

    def cparams():
        return pltpu.CompilerParams(dimension_semantics=("parallel",),
                                    vmem_limit_bytes=vmem_limit)

    adj_p = ops["adj"]

    # --- layer 1: h1 = relu(adj @ (x @ W1) + b1) ---------------------------------------------
    h1 = pl.pallas_call(
        _gc_relu_kernel,
        out_shape=jax.ShapeDtypeStruct((n_pad, h_pad), jnp.bfloat16),
        grid=grid,
        in_specs=[_row_spec(tm, n_pad), _full_spec(ops["x"]),
                  _full_spec(ops["w1"]), _full_spec(ops["b1"])],
        out_specs=_row_spec(tm, h_pad),
        compiler_params=cparams(),
        cost_estimate=pl.CostEstimate(
            flops=2 * n_pad * n_pad * f_pad + 2 * n_pad * f_pad * h_pad,
            transcendentals=0,
            bytes_accessed=2 * n_pad * n_pad + 2 * n_pad * f_pad
                           + 2 * f_pad * h_pad + 2 * n_pad * h_pad),
    )(adj_p, ops["x"], ops["w1"], ops["b1"])

    # --- layer 2: z = GroupNorm(relu(adj @ (h1 @ W2) + b2)) + h1 -----------------------------
    kern2 = functools.partial(_gc_groupnorm_res_kernel, row_tile=tm,
                              group_size=float(ops["gs"]), eps=float(eps))
    z = pl.pallas_call(
        kern2,
        out_shape=jax.ShapeDtypeStruct((n_pad, h_pad), jnp.bfloat16),
        grid=grid,
        in_specs=[_row_spec(tm, n_pad), _full_spec(h1), _full_spec(ops["w2"]),
                  _full_spec(ops["b2"]), _full_spec(ops["grp"]), _full_spec(ops["grp_t"]),
                  _full_spec(ops["gamma"]), _full_spec(ops["beta"])],
        out_specs=_row_spec(tm, h_pad),
        compiler_params=cparams(),
        cost_estimate=pl.CostEstimate(
            flops=2 * n_pad * n_pad * h_pad + 2 * n_pad * h_pad * h_pad
                  + 8 * n_pad * h_pad * g_pad,
            transcendentals=n_pad * h_pad,
            bytes_accessed=2 * n_pad * n_pad + 4 * n_pad * h_pad
                           + 2 * h_pad * h_pad + 8 * h_pad * g_pad),
    )(adj_p, h1, ops["w2"], ops["b2"], ops["grp"], ops["grp_t"], ops["gamma"], ops["beta"])

    # --- layer 3: y = log_softmax(adj @ (z @ W3) + b3) ---------------------------------------
    kern3 = functools.partial(_gc_logsoftmax_kernel, nclass=ops["nclass"])
    out = pl.pallas_call(
        kern3,
        out_shape=jax.ShapeDtypeStruct((n_pad, c_pad), jnp.float32),
        grid=grid,
        in_specs=[_row_spec(tm, n_pad), _full_spec(z), _full_spec(ops["w3"]),
                  _full_spec(ops["b3"])],
        out_specs=_row_spec(tm, c_pad),
        compiler_params=cparams(),
        cost_estimate=pl.CostEstimate(
            flops=2 * n_pad * n_pad * h_pad + 2 * n_pad * h_pad * c_pad,
            transcendentals=2 * n_pad * c_pad,
            bytes_accessed=2 * n_pad * n_pad + 2 * n_pad * h_pad
                           + 2 * h_pad * c_pad + 4 * n_pad * c_pad),
    )(adj_p, z, ops["w3"], ops["b3"])
    return out


@functools.partial(jax.jit, static_argnames=("num_groups", "eps", "row_tile"))
def rgcn3norm_forward(x, adj, w1, b1, w2, b2, gamma, beta, w3, b3,
                      *, num_groups, eps=1e-5, row_tile=256):
    # TODO(synk): F.dropout is identity at inference; training-mode dropout would use
    # pltpu.prng_seed / pltpu.stateful_bernoulli inside the layer kernels.
    ops = _prepare_operands(x, adj, w1, b1, w2, b2, gamma, beta, w3, b3,
                            num_groups=num_groups, row_tile=row_tile)
    out_padded = _forward_padded_pallas(ops, eps)
    return out_padded[:ops["n"], :ops["nclass"]]


# ------------------------------- references (for testing) ----------------------------------

def rgcn3norm_mirror(x, adj, w1, b1, w2, b2, gamma, beta, w3, b3,
                     *, num_groups, eps=1e-5, row_tile=256):
    """Pure-jnp mirror of the padded / bf16-operand kernel pipeline (same dtype staging)."""
    ops = _prepare_operands(x, adj, w1, b1, w2, b2, gamma, beta, w3, b3,
                            num_groups=num_groups, row_tile=row_tile)
    f32, bf16 = jnp.float32, jnp.bfloat16
    adj_p = ops["adj"]

    def gc(feat, w, b):
        agg = jnp.dot(adj_p, feat, preferred_element_type=f32)
        return jnp.dot(agg.astype(bf16), w, preferred_element_type=f32) + b

    h1 = jnp.maximum(gc(ops["x"], ops["w1"], ops["b1"]), 0.0).astype(bf16)
    z = jnp.maximum(gc(h1, ops["w2"], ops["b2"]), 0.0)
    inv_gs = 1.0 / ops["gs"]
    mean_c = jnp.dot(jnp.dot(z, ops["grp"]) * inv_gs, ops["grp_t"])
    dev = z - mean_c
    var_c = jnp.dot(jnp.dot(dev * dev, ops["grp"]) * inv_gs, ops["grp_t"])
    y = dev * jax.lax.rsqrt(var_c + eps) * ops["gamma"] + ops["beta"]
    y = (y + h1.astype(f32)).astype(bf16)
    logits = gc(y, ops["w3"], ops["b3"])
    col = jnp.arange(logits.shape[1])[None, :]
    masked = jnp.where(col < ops["nclass"], logits, -1e30)
    shifted = masked - jnp.max(masked, axis=1, keepdims=True)
    out = shifted - jnp.log(jnp.sum(jnp.exp(shifted), axis=1, keepdims=True))
    return out[:ops["n"], :ops["nclass"]]


def rgcn3norm_reference_f32(x, adj, w1, b1, w2, b2, gamma, beta, w3, b3,
                            *, num_groups, eps=1e-5):
    """Straight f32 port of the PyTorch module (inference mode)."""
    def gc(feat, w, b):
        return adj @ (feat @ w) + b
    h1 = jnp.maximum(gc(x, w1, b1), 0.0)
    h2 = jnp.maximum(gc(h1, w2, b2), 0.0)
    n, c = h2.shape
    gs = c // num_groups
    g = h2.reshape(n, num_groups, gs)
    mean = jnp.mean(g, axis=2, keepdims=True)
    var = jnp.mean((g - mean) ** 2, axis=2, keepdims=True)
    gn = ((g - mean) / jnp.sqrt(var + eps)).reshape(n, c) * gamma[None, :] + beta[None, :]
    h = gn + h1
    return jax.nn.log_softmax(gc(h, w3, b3), axis=1)


if __name__ == "__main__":
    # Small shapes consistent with the module: N nodes, nfeat -> nhid -> nhid -> nclass.
    N, nfeat, nhid, nclass = 64, 32, 64, 8
    num_groups = min(32, nhid)          # as in the module: nn.GroupNorm(min(32, nhid), nhid)

    key = jax.random.PRNGKey(0)
    ks = jax.random.split(key, 10)
    x = jax.random.normal(ks[0], (N, nfeat), dtype=jnp.float32)

    # Symmetric, row-normalized dense adjacency with self-loops.
    a = jax.random.uniform(ks[1], (N, N), dtype=jnp.float32)
    a = ((a + a.T) * 0.5 > 0.8).astype(jnp.float32) + jnp.eye(N, dtype=jnp.float32)
    adj = a / jnp.sum(a, axis=1, keepdims=True)

    # GraphConvolution init: uniform(-stdv, stdv), stdv = 1/sqrt(out_features).
    s1 = 1.0 / float(nhid) ** 0.5
    s3 = 1.0 / float(nclass) ** 0.5
    w1 = jax.random.uniform(ks[2], (nfeat, nhid), jnp.float32, -s1, s1)
    b1 = jax.random.uniform(ks[3], (nhid,), jnp.float32, -s1, s1)
    w2 = jax.random.uniform(ks[4], (nhid, nhid), jnp.float32, -s1, s1)
    b2 = jax.random.uniform(ks[5], (nhid,), jnp.float32, -s1, s1)
    w3 = jax.random.uniform(ks[6], (nhid, nclass), jnp.float32, -s3, s3)
    b3 = jax.random.uniform(ks[7], (nclass,), jnp.float32, -s3, s3)
    # GroupNorm affine parameters (non-trivial values to exercise the affine path).
    gamma = jax.random.uniform(ks[8], (nhid,), jnp.float32, 0.5, 1.5)
    beta = jax.random.uniform(ks[9], (nhid,), jnp.float32, -0.5, 0.5)

    out = rgcn3norm_forward(x, adj, w1, b1, w2, b2, gamma, beta, w3, b3,
                            num_groups=num_groups, row_tile=64)
    out = jax.block_until_ready(out)
    assert out.shape == (N, nclass)

    mirror = rgcn3norm_mirror(x, adj, w1, b1, w2, b2, gamma, beta, w3, b3,
                              num_groups=num_groups, row_tile=64)
    ref = rgcn3norm_reference_f32(x, adj, w1, b1, w2, b2, gamma, beta, w3, b3,
                                  num_groups=num_groups)
    # Tight check against a jnp mirror of the exact padded / bf16-operand kernel math ...
    assert bool(jnp.allclose(out, mirror, atol=1e-2, rtol=1e-2)), "mismatch vs bf16 mirror"
    # ... plus a coarse sanity bound against the straight f32 module semantics (bf16 MXU
    # operands and GroupNorm's eps-limited sensitivity account for the allowed slack).
    assert float(jnp.max(jnp.abs(out - ref))) < 0.3, "mismatch vs f32 reference"

    print("KERNEL_OK")
</pallas_src>

<mosaic_0001>
module attributes {stable_mosaic.version = 11 : i64} {
  func.func @_gc_relu_kernel(%arg0: i32, %arg1: memref<64x128xbf16, #tpu.memory_space<vmem>>, %arg2: memref<128x128xbf16, #tpu.memory_space<vmem>>, %arg3: memref<128x128xbf16, #tpu.memory_space<vmem>>, %arg4: memref<1x128xf32, #tpu.memory_space<vmem>>, %arg5: memref<64x128xbf16, #tpu.memory_space<vmem>>) attributes {dimension_semantics = [#tpu.dimension_semantics<parallel>], iteration_bounds = array<i64: 2>, scalar_prefetch = 0 : i64, scratch_operands = 0 : i64, tpu.core_type = #tpu.core_type<tc>, window_params = [{transform_indices = @transform_0, window_bounds = array<i64: 64, 128>}, {pipeline_mode = #tpu.pipeline_mode<synchronous>, transform_indices = @transform_1, window_bounds = array<i64: 128, 128>}, {pipeline_mode = #tpu.pipeline_mode<synchronous>, transform_indices = @transform_2, window_bounds = array<i64: 128, 128>}, {pipeline_mode = #tpu.pipeline_mode<synchronous>, transform_indices = @transform_3, window_bounds = array<i64: 1, 128>}, {transform_indices = @transform_4, window_bounds = array<i64: 64, 128>}]} {
    %c0 = arith.constant 0 : index
    %c0_0 = arith.constant 0 : index
    %0 = vector.load %arg1[%c0, %c0_0] : memref<64x128xbf16, #tpu.memory_space<vmem>>, vector<64x128xbf16>
    %c0_1 = arith.constant 0 : index
    %c0_2 = arith.constant 0 : index
    %1 = vector.load %arg2[%c0_1, %c0_2] : memref<128x128xbf16, #tpu.memory_space<vmem>>, vector<128x128xbf16>
    %cst = arith.constant dense<0.000000e+00> : vector<64x128xf32>
    %2 = tpu.matmul %0, %1, %cst {dimension_numbers = #tpu.dot_dimension_numbers<[1], [0], [0], [1], [0, 0, 1, 1], [], []>} : vector<64x128xbf16>, vector<128x128xbf16>, vector<64x128xf32> -> vector<64x128xf32>
    %3 = arith.truncf %2 : vector<64x128xf32> to vector<64x128xbf16>
    %c0_3 = arith.constant 0 : index
    %c0_4 = arith.constant 0 : index
    %4 = vector.load %arg3[%c0_3, %c0_4] : memref<128x128xbf16, #tpu.memory_space<vmem>>, vector<128x128xbf16>
    %cst_5 = arith.constant dense<0.000000e+00> : vector<64x128xf32>
    %5 = tpu.matmul %3, %4, %cst_5 {dimension_numbers = #tpu.dot_dimension_numbers<[1], [0], [0], [1], [0, 0, 1, 1], [], []>} : vector<64x128xbf16>, vector<128x128xbf16>, vector<64x128xf32> -> vector<64x128xf32>
    %c0_6 = arith.constant 0 : index
    %c0_7 = arith.constant 0 : index
    %6 = vector.load %arg4[%c0_6, %c0_7] : memref<1x128xf32, #tpu.memory_space<vmem>>, vector<1x128xf32>
    %7 = vector.broadcast %6 : vector<1x128xf32> to vector<64x128xf32>
    %8 = arith.addf %5, %7 : vector<64x128xf32>
    %cst_8 = arith.constant 0.000000e+00 : f32
    %9 = vector.broadcast %cst_8 : f32 to vector<64x128xf32>
    %10 = arith.maximumf %8, %9 : vector<64x128xf32>
    %11 = arith.truncf %10 : vector<64x128xf32> to vector<64x128xbf16>
    %c0_9 = arith.constant 0 : index
    %c0_10 = arith.constant 0 : index
    %12 = vector.load %arg5[%c0_9, %c0_10] : memref<64x128xbf16, #tpu.memory_space<vmem>>, vector<64x128xbf16>
    tpu.vector_store %arg5[%c0_9, %c0_10], %11 {strides = array<i32>} : memref<64x128xbf16, #tpu.memory_space<vmem>>, vector<64x128xbf16>,
    return
  }
  func.func @transform_0(%arg0: i32) -> (i32, i32) {
    %c0_i32 = arith.constant 0 : i32
    %c0_i32_0 = arith.constant 0 : i32
    return %arg0, %c0_i32 : i32, i32
  }
  func.func @transform_1(%arg0: i32) -> (i32, i32) {
    %c0_i32 = arith.constant 0 : i32
    %c0_i32_0 = arith.constant 0 : i32
    %c0_i32_1 = arith.constant 0 : i32
    return %c0_i32, %c0_i32_0 : i32, i32
  }
  func.func @transform_2(%arg0: i32) -> (i32, i32) {
    %c0_i32 = arith.constant 0 : i32
    %c0_i32_0 = arith.constant 0 : i32
    %c0_i32_1 = arith.constant 0 : i32
    return %c0_i32, %c0_i32_0 : i32, i32
  }
  func.func @transform_3(%arg0: i32) -> (i32, i32) {
    %c0_i32 = arith.constant 0 : i32
    %c0_i32_0 = arith.constant 0 : i32
    %c0_i32_1 = arith.constant 0 : i32
    return %c0_i32, %c0_i32_0 : i32, i32
  }
  func.func @transform_4(%arg0: i32) -> (i32, i32) {
    %c0_i32 = arith.constant 0 : i32
    %c0_i32_0 = arith.constant 0 : i32
    return %arg0, %c0_i32 : i32, i32
  }
}

module attributes {stable_mosaic.version = 11 : i64} {
  func.func @_gc_groupnorm_res_kernel(%arg0: i32, %arg1: memref<64x128xbf16, #tpu.memory_space<vmem>>, %arg2: memref<128x128xbf16, #tpu.memory_space<vmem>>, %arg3: memref<128x128xbf16, #tpu.memory_space<vmem>>, %arg4: memref<1x128xf32, #tpu.memory_space<vmem>>, %arg5: memref<128x128xf32, #tpu.memory_space<vmem>>, %arg6: memref<128x128xf32, #tpu.memory_space<vmem>>, %arg7: memref<1x128xf32, #tpu.memory_space<vmem>>, %arg8: memref<1x128xf32, #tpu.memory_space<vmem>>, %arg9: memref<64x128xbf16, #tpu.memory_space<vmem>>) attributes {dimension_semantics = [#tpu.dimension_semantics<parallel>], iteration_bounds = array<i64: 2>, scalar_prefetch = 0 : i64, scratch_operands = 0 : i64, tpu.core_type = #tpu.core_type<tc>, window_params = [{transform_indices = @transform_0, window_bounds = array<i64: 64, 128>}, {pipeline_mode = #tpu.pipeline_mode<synchronous>, transform_indices = @transform_1, window_bounds = array<i64: 128, 128>}, {pipeline_mode = #tpu.pipeline_mode<synchronous>, transform_indices = @transform_2, window_bounds = array<i64: 128, 128>}, {pipeline_mode = #tpu.pipeline_mode<synchronous>, transform_indices = @transform_3, window_bounds = array<i64: 1, 128>}, {pipeline_mode = #tpu.pipeline_mode<synchronous>, transform_indices = @transform_4, window_bounds = array<i64: 128, 128>}, {pipeline_mode = #tpu.pipeline_mode<synchronous>, transform_indices = @transform_5, window_bounds = array<i64: 128, 128>}, {pipeline_mode = #tpu.pipeline_mode<synchronous>, transform_indices = @transform_6, window_bounds = array<i64: 1, 128>}, {pipeline_mode = #tpu.pipeline_mode<synchronous>, transform_indices = @transform_7, window_bounds = array<i64: 1, 128>}, {transform_indices = @transform_8, window_bounds = array<i64: 64, 128>}]} {
    %c0 = arith.constant 0 : index
    %c0_0 = arith.constant 0 : index
    %0 = vector.load %arg1[%c0, %c0_0] : memref<64x128xbf16, #tpu.memory_space<vmem>>, vector<64x128xbf16>
    %c0_1 = arith.constant 0 : index
    %c0_2 = arith.constant 0 : index
    %1 = vector.load %arg2[%c0_1, %c0_2] : memref<128x128xbf16, #tpu.memory_space<vmem>>, vector<128x128xbf16>
    %cst = arith.constant dense<0.000000e+00> : vector<64x128xf32>
    %2 = tpu.matmul %0, %1, %cst {dimension_numbers = #tpu.dot_dimension_numbers<[1], [0], [0], [1], [0, 0, 1, 1], [], []>} : vector<64x128xbf16>, vector<128x128xbf16>, vector<64x128xf32> -> vector<64x128xf32>
    %3 = arith.truncf %2 : vector<64x128xf32> to vector<64x128xbf16>
    %c0_3 = arith.constant 0 : index
    %c0_4 = arith.constant 0 : index
    %4 = vector.load %arg3[%c0_3, %c0_4] : memref<128x128xbf16, #tpu.memory_space<vmem>>, vector<128x128xbf16>
    %cst_5 = arith.constant dense<0.000000e+00> : vector<64x128xf32>
    %5 = tpu.matmul %3, %4, %cst_5 {dimension_numbers = #tpu.dot_dimension_numbers<[1], [0], [0], [1], [0, 0, 1, 1], [], []>} : vector<64x128xbf16>, vector<128x128xbf16>, vector<64x128xf32> -> vector<64x128xf32>
    %c0_6 = arith.constant 0 : index
    %c0_7 = arith.constant 0 : index
    %6 = vector.load %arg4[%c0_6, %c0_7] : memref<1x128xf32, #tpu.memory_space<vmem>>, vector<1x128xf32>
    %7 = vector.broadcast %6 : vector<1x128xf32> to vector<64x128xf32>
    %8 = arith.addf %5, %7 : vector<64x128xf32>
    %cst_8 = arith.constant 0.000000e+00 : f32
    %9 = vector.broadcast %cst_8 : f32 to vector<64x128xf32>
    %10 = arith.maximumf %8, %9 : vector<64x128xf32>
    %c0_9 = arith.constant 0 : index
    %c0_10 = arith.constant 0 : index
    %11 = vector.load %arg5[%c0_9, %c0_10] : memref<128x128xf32, #tpu.memory_space<vmem>>, vector<128x128xf32>
    %c0_11 = arith.constant 0 : index
    %c0_12 = arith.constant 0 : index
    %12 = vector.load %arg6[%c0_11, %c0_12] : memref<128x128xf32, #tpu.memory_space<vmem>>, vector<128x128xf32>
    %cst_13 = arith.constant dense<0.000000e+00> : vector<64x128xf32>
    %13 = tpu.matmul %10, %11, %cst_13 {dimension_numbers = #tpu.dot_dimension_numbers<[1], [0], [0], [1], [0, 0, 1, 1], [], []>} : vector<64x128xf32>, vector<128x128xf32>, vector<64x128xf32> -> vector<64x128xf32>
    %cst_14 = arith.constant 5.000000e-01 : f32
    %14 = vector.broadcast %cst_14 : f32 to vector<64x128xf32>
    %15 = arith.mulf %13, %14 : vector<64x128xf32>
    %cst_15 = arith.constant dense<0.000000e+00> : vector<64x128xf32>
    %16 = tpu.matmul %15, %12, %cst_15 {dimension_numbers = #tpu.dot_dimension_numbers<[1], [0], [0], [1], [0, 0, 1, 1], [], []>} : vector<64x128xf32>, vector<128x128xf32>, vector<64x128xf32> -> vector<64x128xf32>
    %17 = arith.subf %10, %16 : vector<64x128xf32>
    %18 = arith.mulf %17, %17 : vector<64x128xf32>
    %cst_16 = arith.constant dense<0.000000e+00> : vector<64x128xf32>
    %19 = tpu.matmul %18, %11, %cst_16 {dimension_numbers = #tpu.dot_dimension_numbers<[1], [0], [0], [1], [0, 0, 1, 1], [], []>} : vector<64x128xf32>, vector<128x128xf32>, vector<64x128xf32> -> vector<64x128xf32>
    %cst_17 = arith.constant 5.000000e-01 : f32
    %20 = vector.broadcast %cst_17 : f32 to vector<64x128xf32>
    %21 = arith.mulf %19, %20 : vector<64x128xf32>
    %cst_18 = arith.constant dense<0.000000e+00> : vector<64x128xf32>
    %22 = tpu.matmul %21, %12, %cst_18 {dimension_numbers = #tpu.dot_dimension_numbers<[1], [0], [0], [1], [0, 0, 1, 1], [], []>} : vector<64x128xf32>, vector<128x128xf32>, vector<64x128xf32> -> vector<64x128xf32>
    %cst_19 = arith.constant 9.99999974E-6 : f32
    %23 = vector.broadcast %cst_19 : f32 to vector<64x128xf32>
    %24 = arith.addf %22, %23 : vector<64x128xf32>
    %25 = math.rsqrt %24 : vector<64x128xf32>
    %26 = arith.mulf %17, %25 : vector<64x128xf32>
    %c0_20 = arith.constant 0 : index
    %c0_21 = arith.constant 0 : index
    %27 = vector.load %arg7[%c0_20, %c0_21] : memref<1x128xf32, #tpu.memory_space<vmem>>, vector<1x128xf32>
    %28 = vector.broadcast %27 : vector<1x128xf32> to vector<64x128xf32>
    %29 = arith.mulf %26, %28 : vector<64x128xf32>
    %c0_22 = arith.constant 0 : index
    %c0_23 = arith.constant 0 : index
    %30 = vector.load %arg8[%c0_22, %c0_23] : memref<1x128xf32, #tpu.memory_space<vmem>>, vector<1x128xf32>
    %31 = vector.broadcast %30 : vector<1x128xf32> to vector<64x128xf32>
    %32 = arith.addf %29, %31 : vector<64x128xf32>
    %c64_i32 = arith.constant 64 : i32
    %33 = arith.muli %arg0, %c64_i32 : i32
    %34 = tpu.assume_multiple %33, 64 : i32
    %35 = arith.index_cast %34 : i32 to index
    %c0_24 = arith.constant 0 : index
    %36 = vector.load %arg2[%35, %c0_24] : memref<128x128xbf16, #tpu.memory_space<vmem>>, vector<64x128xbf16>
    %37 = arith.extf %36 : vector<64x128xbf16> to vector<64x128xf32>
    %38 = arith.addf %32, %37 : vector<64x128xf32>
    %39 = arith.truncf %38 : vector<64x128xf32> to vector<64x128xbf16>
    %c0_25 = arith.constant 0 : index
    %c0_26 = arith.constant 0 : index
    %40 = vector.load %arg9[%c0_25, %c0_26] : memref<64x128xbf16, #tpu.memory_space<vmem>>, vector<64x128xbf16>
    tpu.vector_store %arg9[%c0_25, %c0_26], %39 {strides = array<i32>} : memref<64x128xbf16, #tpu.memory_space<vmem>>, vector<64x128xbf16>,
    return
  }
  func.func @transform_0(%arg0: i32) -> (i32, i32) {
    %c0_i32 = arith.constant 0 : i32
    %c0_i32_0 = arith.constant 0 : i32
    return %arg0, %c0_i32 : i32, i32
  }
  func.func @transform_1(%arg0: i32) -> (i32, i32) {
    %c0_i32 = arith.constant 0 : i32
    %c0_i32_0 = arith.constant 0 : i32
    %c0_i32_1 = arith.constant 0 : i32
    return %c0_i32, %c0_i32_0 : i32, i32
  }
  func.func @transform_2(%arg0: i32) -> (i32, i32) {
    %c0_i32 = arith.constant 0 : i32
    %c0_i32_0 = arith.constant 0 : i32
    %c0_i32_1 = arith.constant 0 : i32
    return %c0_i32, %c0_i32_0 : i32, i32
  }
  func.func @transform_3(%arg0: i32) -> (i32, i32) {
    %c0_i32 = arith.constant 0 : i32
    %c0_i32_0 = arith.constant 0 : i32
    %c0_i32_1 = arith.constant 0 : i32
    return %c0_i32, %c0_i32_0 : i32, i32
  }
  func.func @transform_4(%arg0: i32) -> (i32, i32) {
    %c0_i32 = arith.constant 0 : i32
    %c0_i32_0 = arith.constant 0 : i32
    %c0_i32_1 = arith.constant 0 : i32
    return %c0_i32, %c0_i32_0 : i32, i32
  }
  func.func @transform_5(%arg0: i32) -> (i32, i32) {
    %c0_i32 = arith.constant 0 : i32
    %c0_i32_0 = arith.constant 0 : i32
    %c0_i32_1 = arith.constant 0 : i32
    return %c0_i32, %c0_i32_0 : i32, i32
  }
  func.func @transform_6(%arg0: i32) -> (i32, i32) {
    %c0_i32 = arith.constant 0 : i32
    %c0_i32_0 = arith.constant 0 : i32
    %c0_i32_1 = arith.constant 0 : i32
    return %c0_i32, %c0_i32_0 : i32, i32
  }
  func.func @transform_7(%arg0: i32) -> (i32, i32) {
    %c0_i32 = arith.constant 0 : i32
    %c0_i32_0 = arith.constant 0 : i32
    %c0_i32_1 = arith.constant 0 : i32
    return %c0_i32, %c0_i32_0 : i32, i32
  }
  func.func @transform_8(%arg0: i32) -> (i32, i32) {
    %c0_i32 = arith.constant 0 : i32
    %c0_i32_0 = arith.constant 0 : i32
    return %arg0, %c0_i32 : i32, i32
  }
}

module attributes {stable_mosaic.version = 11 : i64} {
  func.func @_gc_logsoftmax_kernel(%arg0: i32, %arg1: memref<64x128xbf16, #tpu.memory_space<vmem>>, %arg2: memref<128x128xbf16, #tpu.memory_space<vmem>>, %arg3: memref<128x128xbf16, #tpu.memory_space<vmem>>, %arg4: memref<1x128xf32, #tpu.memory_space<vmem>>, %arg5: memref<64x128xf32, #tpu.memory_space<vmem>>) attributes {dimension_semantics = [#tpu.dimension_semantics<parallel>], iteration_bounds = array<i64: 2>, scalar_prefetch = 0 : i64, scratch_operands = 0 : i64, tpu.core_type = #tpu.core_type<tc>, window_params = [{transform_indices = @transform_0, window_bounds = array<i64: 64, 128>}, {pipeline_mode = #tpu.pipeline_mode<synchronous>, transform_indices = @transform_1, window_bounds = array<i64: 128, 128>}, {pipeline_mode = #tpu.pipeline_mode<synchronous>, transform_indices = @transform_2, window_bounds = array<i64: 128, 128>}, {pipeline_mode = #tpu.pipeline_mode<synchronous>, transform_indices = @transform_3, window_bounds = array<i64: 1, 128>}, {transform_indices = @transform_4, window_bounds = array<i64: 64, 128>}]} {
    %c0 = arith.constant 0 : index
    %c0_0 = arith.constant 0 : index
    %0 = vector.load %arg1[%c0, %c0_0] : memref<64x128xbf16, #tpu.memory_space<vmem>>, vector<64x128xbf16>
    %c0_1 = arith.constant 0 : index
    %c0_2 = arith.constant 0 : index
    %1 = vector.load %arg2[%c0_1, %c0_2] : memref<128x128xbf16, #tpu.memory_space<vmem>>, vector<128x128xbf16>
    %cst = arith.constant dense<0.000000e+00> : vector<64x128xf32>
    %2 = tpu.matmul %0, %1, %cst {dimension_numbers = #tpu.dot_dimension_numbers<[1], [0], [0], [1], [0, 0, 1, 1], [], []>} : vector<64x128xbf16>, vector<128x128xbf16>, vector<64x128xf32> -> vector<64x128xf32>
    %3 = arith.truncf %2 : vector<64x128xf32> to vector<64x128xbf16>
    %c0_3 = arith.constant 0 : index
    %c0_4 = arith.constant 0 : index
    %4 = vector.load %arg3[%c0_3, %c0_4] : memref<128x128xbf16, #tpu.memory_space<vmem>>, vector<128x128xbf16>
    %cst_5 = arith.constant dense<0.000000e+00> : vector<64x128xf32>
    %5 = tpu.matmul %3, %4, %cst_5 {dimension_numbers = #tpu.dot_dimension_numbers<[1], [0], [0], [1], [0, 0, 1, 1], [], []>} : vector<64x128xbf16>, vector<128x128xbf16>, vector<64x128xf32> -> vector<64x128xf32>
    %c0_6 = arith.constant 0 : index
    %c0_7 = arith.constant 0 : index
    %6 = vector.load %arg4[%c0_6, %c0_7] : memref<1x128xf32, #tpu.memory_space<vmem>>, vector<1x128xf32>
    %7 = vector.broadcast %6 : vector<1x128xf32> to vector<64x128xf32>
    %8 = arith.addf %5, %7 : vector<64x128xf32>
    %9 = tpu.iota {dimensions = array<i32: 1>} : vector<64x128xi32>
    %c8_i32 = arith.constant 8 : i32
    %10 = vector.broadcast %c8_i32 : i32 to vector<64x128xi32>
    %11 = arith.cmpi slt, %9, %10 : vector<64x128xi32>
    %cst_8 = arith.constant -1.000000e+30 : f32
    %12 = vector.broadcast %cst_8 : f32 to vector<64x128xf32>
    %13 = arith.select %11, %8, %12 : vector<64x128xi1>, vector<64x128xf32>
    %cst_9 = arith.constant dense<0xFF800000> : vector<64xf32>
    %14 = vector.multi_reduction <maximumf>, %13, %cst_9 [1] : vector<64x128xf32> to vector<64xf32>
    %15 = vector.shape_cast %14 : vector<64xf32> to vector<64x1xf32>
    %16 = vector.broadcast %15 : vector<64x1xf32> to vector<64x128xf32>
    %17 = arith.subf %13, %16 : vector<64x128xf32>
    %18 = math.exp %17 : vector<64x128xf32>
    %cst_10 = arith.constant dense<0.000000e+00> : vector<64xf32>
    %19 = vector.multi_reduction <add>, %18, %cst_10 [1] : vector<64x128xf32> to vector<64xf32>
    %20 = vector.shape_cast %19 : vector<64xf32> to vector<64x1xf32>
    %21 = math.log %20 : vector<64x1xf32>
    %22 = vector.broadcast %21 : vector<64x1xf32> to vector<64x128xf32>
    %23 = arith.subf %17, %22 : vector<64x128xf32>
    %c0_11 = arith.constant 0 : index
    %c0_12 = arith.constant 0 : index
    %24 = vector.load %arg5[%c0_11, %c0_12] : memref<64x128xf32, #tpu.memory_space<vmem>>, vector<64x128xf32>
    tpu.vector_store %arg5[%c0_11, %c0_12], %23 {strides = array<i32>} : memref<64x128xf32, #tpu.memory_space<vmem>>, vector<64x128xf32>,
    return
  }
  func.func @transform_0(%arg0: i32) -> (i32, i32) {
    %c0_i32 = arith.constant 0 : i32
    %c0_i32_0 = arith.constant 0 : i32
    return %arg0, %c0_i32 : i32, i32
  }
  func.func @transform_1(%arg0: i32) -> (i32, i32) {
    %c0_i32 = arith.constant 0 : i32
    %c0_i32_0 = arith.constant 0 : i32
    %c0_i32_1 = arith.constant 0 : i32
    return %c0_i32, %c0_i32_0 : i32, i32
  }
  func.func @transform_2(%arg0: i32) -> (i32, i32) {
    %c0_i32 = arith.constant 0 : i32
    %c0_i32_0 = arith.constant 0 : i32
    %c0_i32_1 = arith.constant 0 : i32
    return %c0_i32, %c0_i32_0 : i32, i32
  }
  func.func @transform_3(%arg0: i32) -> (i32, i32) {
    %c0_i32 = arith.constant 0 : i32
    %c0_i32_0 = arith.constant 0 : i32
    %c0_i32_1 = arith.constant 0 : i32
    return %c0_i32, %c0_i32_0 : i32, i32
  }
  func.func @transform_4(%arg0: i32) -> (i32, i32) {
    %c0_i32 = arith.constant 0 : i32
    %c0_i32_0 = arith.constant 0 : i32
    return %arg0, %c0_i32 : i32, i32
  }
}

</mosaic_0001>

<bundles_post_ra>
// kernel: rgcn3norm_forward.3
= control target key start
LH: loop header
LB: loop body
LE: loop exit
PB: predicated region body
PF: predicated region fallthrough
CT: control target
= control target key end

     0   :  { %s811_s15 = smov 0   ;;  %s892_s0 = inlined_call_operand.vmem [shape: bf16[128,128], index: 0, kind: input, shape index: {}]   ;;  %s893_s1 = inlined_call_operand.vmem [shape: bf16[128,128], index: 1, kind: input, shape index: {}]   ;;  %s894_s2 = inlined_call_operand.vmem [shape: bf16[128,128], index: 2, kind: input, shape index: {}]   ;;  %s895_s3 = inlined_call_operand.vmem [shape: f32[1,128], index: 3, kind: input, shape index: {}]   ;;  %s896_s4 = inlined_call_operand.vmem [shape: bf16[128,128], index: 4, kind: output, shape index: {}]  }
   0x1 LB: > { %s607_s16 = sadd.s32 4294967295, %s784_s15   ;;  %p611_p0 = scmp.ge.s32.totalorder %s784_s15, 1  ;;  %s784_s15 = sphi %s811_s15, %s14_s15  }
   0x2   : > { %p163_p1 = scmp.lt.s32.totalorder %s784_s15, 3 }
   0x4   : > { %p164_p2 = pnand %p611_p0, %p163_p1 }
   0x5   : > { %v758_v0 = vld [vmem:[%s893_s1] sm:$0xff] (!%p164_p2)   ;;  %s612_s19 = sshll.u32 (!%p164_p2), %s607_s16, 3  ;;  %v759_v1 = vld [vmem:[%s893_s1 + $0x8] sm:$0xff] (!%p164_p2)   ;;  %v760_v2 = vld [vmem:[%s893_s1 + $0x10] sm:$0xff] (!%p164_p2)  }
   0x6   : > { %167 = sbr.rel (%p164_p2) target bundleno = 486 (0x1e6), region = 36  ;;  %p190_p3 = scmp.lt.s32.totalorder (!%p164_p2), %s612_s19, 15  ;;  %702 = vmatprep.subr.bf16.mxu0 (!%p164_p2), %v758_v0  ;;  %v761_v3 = vld [vmem:[%s893_s1 + $0x18] sm:$0xff] (!%p164_p2)   ;;  %v762_v5 = vld [vmem:[%s893_s1 + $0x20] sm:$0xff] (!%p164_p2)   ;;  %v771_v7 = vld [vmem:[%s894_s2 + $0x8] sm:$0xff] (!%p164_p2)  }
   0x7   : > { %703 = vmatpush3.bf16.msra.mxu0 (!%p164_p2), %v758_v0  ;;  %v770_v6 = vld [vmem:[%s894_s2] sm:$0xff] (!%p164_p2)   ;;  %v763_v8 = vld [vmem:[%s893_s1 + $0x28] sm:$0xff] (!%p164_p2)   ;;  %v772_v9 = vld [vmem:[%s894_s2 + $0x10] sm:$0xff] (!%p164_p2)  }
   0x8   : > { %704 = vmatprep.subr.bf16.mxu0 (!%p164_p2), %v759_v1  ;;  %726 = vmatprep.subr.bf16.mxu1 (!%p164_p2), %v770_v6  ;;  %v764_v10 = vld [vmem:[%s893_s1 + $0x30] sm:$0xff] (!%p164_p2)   ;;  %v773_v11 = vld [vmem:[%s894_s2 + $0x18] sm:$0xff] (!%p164_p2)   ;;  %v774_v13 = vld [vmem:[%s894_s2 + $0x20] sm:$0xff] (!%p164_p2)  }
   0x9   : > { %727 = vmatpush3.bf16.msra.mxu1 (!%p164_p2), %v770_v6  ;;  %v765_v12 = vld [vmem:[%s893_s1 + $0x38] sm:$0xff] (!%p164_p2)   ;;  %v775_v14 = vld [vmem:[%s894_s2 + $0x28] sm:$0xff] (!%p164_p2)   ;;  %v776_v17 = vld [vmem:[%s894_s2 + $0x30] sm:$0xff] (!%p164_p2)  }
   0xa   : > { %728 = vmatprep.subr.bf16.mxu1 (!%p164_p2), %v771_v7  ;;  %v777_v19 = vld [vmem:[%s894_s2 + $0x38] sm:$0xff] (!%p164_p2)   ;;  %v628_v32 = vld [vmem:[%s895_s3] ss:$0 sm:$0xff] (!%p164_p2) }
   0xb   : > { %705 = vmatpush3.bf16.msra.mxu0 (!%p164_p2), %v759_v1 }
   0xc   : > { %706 = vmatprep.subr.bf16.mxu0 (!%p164_p2), %v760_v2 }
   0xd   : > { %s898_s19 = smov (!%p190_p3, %s612_s19), 15  ;;  %729 = vmatpush3.bf16.msra.mxu1 %v771_v7 }
   0xe   : > { %s613_s24 = sshll.u32 %s898_s19, 2  ;;  %730 = vmatprep.subr.bf16.mxu1 %v772_v9 }
   0xf   : > { %s836_s27 = scalar_lea.vmem %s892_s0, %s613_s24  ;;  %707 = vmatpush3.bf16.msra.mxu0 %v760_v2  ;;  %s199_s9 = scalar_lea.vmem %s896_s4, %s613_s24 }
  0x10   : > { %v766_v4 = vld [vmem:[%s836_s27] sm:$0xff]   ;;  %708 = vmatprep.subr.bf16.mxu0 %v761_v3  ;;  %v767_v15 = vld [vmem:[%s836_s27 + $0x8] sm:$0xff]   ;;  %v768_v16 = vld [vmem:[%s836_s27 + $0x10] sm:$0xff]  }
  0x11   : > { %718 = vmatprep.mubr.bf16.mxu0 %v766_v4  ;;  %731 = vmatpush3.bf16.msra.mxu1 %v772_v9  ;;  %v769_v18 = vld [vmem:[%s836_s27 + $0x18] sm:$0xff]  }
  0x12   : > { %732 = vmatprep.subr.bf16.mxu1 %v773_v11 }
  0x13   : > { %709 = vmatpush3.bf16.msra.mxu0 %v761_v3 }
  0x14   : > { %710 = vmatprep.subr.bf16.mxu0 %v762_v5 }
  0x15   : > { %733 = vmatpush3.bf16.msra.mxu1 %v773_v11 }
  0x16   : > { %734 = vmatprep.subr.bf16.mxu1 %v774_v13 }
  0x17   : > { %711 = vmatpush3.bf16.msra.mxu0 %v762_v5 }
  0x18   : > { %712 = vmatprep.subr.bf16.mxu0 %v763_v8 }
  0x19   : > { %735 = vmatpush3.bf16.msra.mxu1 %v774_v13 }
  0x1a   : > { %736 = vmatprep.subr.bf16.mxu1 %v775_v14 }
  0x1b   : > { %713 = vmatpush3.bf16.msra.mxu0 %v763_v8 }
  0x1c   : > { %714 = vmatprep.subr.bf16.mxu0 %v764_v10 }
  0x1d   : > { %737 = vmatpush3.bf16.msra.mxu1 %v775_v14 }
  0x1e   : > { %738 = vmatprep.subr.bf16.mxu1 %v776_v17 }
  0x1f   : > { %715 = vmatpush3.bf16.msra.mxu0 %v764_v10 }
  0x20   : > { %716 = vmatprep.subr.bf16.mxu0 %v765_v12 }
  0x21   : > { %739 = vmatpush3.bf16.msra.mxu1 %v776_v17 }
  0x22   : > { %740 = vmatprep.subr.bf16.mxu1 %v777_v19 }
  0x23   : > { %717 = vmatpush3.bf16.msra.mxu0 %v765_v12 }
  0x25   : > { %741 = vmatpush3.bf16.msra.mxu1 %v777_v19 }
  0x26   : > { %719 = vmatmul.mubr.bf16.vlgmr.msra.gmra.mrb[0].mxu0 %v767_v15 }
  0x27   : > { %722 = vmatprep.mubr.bf16.mxu0 %v768_v16 }
  0x2e   : > { %723 = vmatmul.mubr.bf16.gmra.mrb[4].mxu0 %v769_v18 }
  0xf9   : > { %v720_v20 = vpop.f32.mrb[0].mxu0 }
  0xfa   : > { %v332_v21 = vpop.f32.mrb[1].mxu0 }
  0xfb   : > { %v721_v22 = vpop.f32.mrb[2].mxu0 }
  0xfc   : > { %v364_v23 = vpack.c.bf16 %v721_v22, %v720_v20  ;;  %v335_v24 = vpop.f32.mrb[3].mxu0 }
  0xfd   : > { %v363_v25 = vpack.c.bf16 %v335_v24, %v332_v21 }
  0xff   : > { %742 = vmatprep.mubr.bf16.mxu1 %v363_v25 }
 0x100   : > { %743 = vmatmul.mubr.bf16.vlgmr.msra.gmra.mrb[0].mxu1 %v364_v23 }
 0x101   : > { %v724_v26 = vpop.f32.mrb[4].mxu0 }
 0x102   : > { %v348_v27 = vpop.f32.mrb[5].mxu0 }
 0x103   : > { %v725_v28 = vpop.f32.mrb[6].mxu0 }
 0x104   : > { %v366_v29 = vpack.c.bf16 %v725_v28, %v724_v26  ;;  %v351_v30 = vpop.f32.mrb[7].mxu0 }
 0x105   : > { %v365_v31 = vpack.c.bf16 %v351_v30, %v348_v27 }
 0x107   : > { %746 = vmatprep.mubr.bf16.mxu1 %v365_v31 }
 0x108   : > { %747 = vmatmul.mubr.bf16.gmra.mrb[4].mxu1 %v366_v29 }
 0x1d3   : > { %v744_v33 = vpop.f32.mrb[0].mxu1 }
 0x1d4   : > { %v481_v34 = vadd.f32 %v744_v33, %v628_v32  ;;  %v472_v35 = vpop.f32.mrb[1].mxu1 }
 0x1d5   : > { %v473_v36 = vadd.f32 %v628_v32, %v472_v35  ;;  %v745_v37 = vpop.f32.mrb[2].mxu1 }
 0x1d6   : > { %v484_v38 = vadd.f32 %v745_v37, %v628_v32  ;;  %v475_v39 = vpop.f32.mrb[3].mxu1  ;;  %v505_v41 = vmax.f32 %v481_v34, 0.0 }
 0x1d7   : > { %v476_v40 = vadd.f32 %v628_v32, %v475_v39  ;;  %v503_v43 = vmax.f32 %v473_v36, 0.0 }
 0x1d8   : > { %v506_v42 = vmax.f32 %v484_v38, 0.0 }
 0x1d9   : > { %v504_v44 = vmax.f32 %v476_v40, 0.0 }
 0x1da   : > { %v663_v45 = vpack.c.bf16 %v506_v42, %v505_v41 }
 0x1db   : > { %v658_v46 = vpack.c.bf16 %v504_v44, %v503_v43  ;;  %v748_v47 = vpop.f32.mrb[4].mxu1 }
 0x1dc   : > { %675 = vst [vmem:[%s199_s9 + $0x8] sm:$0xff] %v663_v45   ;;  %v497_v48 = vadd.f32 %v748_v47, %v628_v32  ;;  %v488_v49 = vpop.f32.mrb[5].mxu1 }
 0x1dd   : > { %659 = vst [vmem:[%s199_s9] sm:$0xff] %v658_v46   ;;  %v489_v50 = vadd.f32 %v628_v32, %v488_v49  ;;  %v749_v51 = vpop.f32.mrb[6].mxu1 }
 0x1de   : > { %v500_v52 = vadd.f32 %v749_v51, %v628_v32  ;;  %v491_v53 = vpop.f32.mrb[7].mxu1  ;;  %v509_v55 = vmax.f32 %v497_v48, 0.0 }
 0x1df   : > { %v492_v54 = vadd.f32 %v628_v32, %v491_v53  ;;  %v507_v57 = vmax.f32 %v489_v50, 0.0 }
 0x1e0   : > { %v510_v56 = vmax.f32 %v500_v52, 0.0 }
 0x1e1   : > { %v508_v58 = vmax.f32 %v492_v54, 0.0 }
 0x1e2   : > { %v673_v59 = vpack.c.bf16 %v510_v56, %v509_v55 }
 0x1e3   : > { %v668_v60 = vpack.c.bf16 %v508_v58, %v507_v57 }
 0x1e4   : > { %677 = vst [vmem:[%s199_s9 + $0x18] sm:$0xff] %v673_v59  }
 0x1e5   : > { %676 = vst [vmem:[%s199_s9 + $0x10] sm:$0xff] %v668_v60  }
 0x1e6 PF: > { %s14_s15 = sadd.s32 1, %s784_s15  }
 0x1e7   : > { %p11_p4 = scmp.ge.s32.totalorder %s14_s15, 4  }
 0x1e9   :  { %13 = sbr.rel (!%p11_p4) target bundleno = 1 (0x1), region = 66 }

// kernel: rgcn3norm_forward.5
= control target key start
LH: loop header
LB: loop body
LE: loop exit
PB: predicated region body
PF: predicated region fallthrough
CT: control target
= control target key end

     0   :  { %s855_s15 = smov 0   ;;  %s983_s0 = inlined_call_operand.vmem [shape: bf16[128,128], index: 0, kind: input, shape index: {}]   ;;  %s984_s1 = inlined_call_operand.vmem [shape: bf16[128,128], index: 1, kind: input, shape index: {}]   ;;  %s985_s2 = inlined_call_operand.vmem [shape: bf16[128,128], index: 2, kind: input, shape index: {}]   ;;  %s986_s3 = inlined_call_operand.vmem [shape: f32[1,128], index: 3, kind: input, shape index: {}]   ;;  %s987_s4 = inlined_call_operand.vmem [shape: f32[128,128], index: 4, kind: output, shape index: {}]  }
   0x1 LB: > { %s658_s16 = sadd.s32 4294967295, %s828_s15   ;;  %p662_p0 = scmp.ge.s32.totalorder %s828_s15, 1  ;;  %s828_s15 = sphi %s855_s15, %s14_s15  }
   0x2   : > { %p163_p1 = scmp.lt.s32.totalorder %s828_s15, 3 }
   0x4   : > { %p164_p2 = pnand %p662_p0, %p163_p1 }
   0x5   : > { %v770_v0 = vld [vmem:[%s984_s1] sm:$0xff] (!%p164_p2)   ;;  %s663_s19 = sshll.u32 (!%p164_p2), %s658_s16, 3  ;;  %v771_v1 = vld [vmem:[%s984_s1 + $0x8] sm:$0xff] (!%p164_p2)   ;;  %v772_v2 = vld [vmem:[%s984_s1 + $0x10] sm:$0xff] (!%p164_p2)   ;;  %v503_v32 = vlaneseq (!%p164_p2) }
   0x6   : > { %167 = sbr.rel (%p164_p2) target bundleno = 802 (0x322), region = 36  ;;  %p190_p3 = scmp.lt.s32.totalorder (!%p164_p2), %s663_s19, 15  ;;  %714 = vmatprep.subr.bf16.mxu0 (!%p164_p2), %v770_v0  ;;  %v773_v3 = vld [vmem:[%s984_s1 + $0x18] sm:$0xff] (!%p164_p2)   ;;  %v774_v5 = vld [vmem:[%s984_s1 + $0x20] sm:$0xff] (!%p164_p2)   ;;  %v783_v7 = vld [vmem:[%s985_s2 + $0x8] sm:$0xff] (!%p164_p2)  }
   0x7   : > { %715 = vmatpush3.bf16.msra.mxu0 (!%p164_p2), %v770_v0  ;;  %v782_v6 = vld [vmem:[%s985_s2] sm:$0xff] (!%p164_p2)   ;;  %v775_v8 = vld [vmem:[%s984_s1 + $0x28] sm:$0xff] (!%p164_p2)   ;;  %v784_v9 = vld [vmem:[%s985_s2 + $0x10] sm:$0xff] (!%p164_p2)   ;;  %v504_v33 = vand.u32 (!%p164_p2), 127, %v503_v32 }
   0x8   : > { %716 = vmatprep.subr.bf16.mxu0 (!%p164_p2), %v771_v1  ;;  %738 = vmatprep.subr.bf16.mxu1 (!%p164_p2), %v782_v6  ;;  %v776_v10 = vld [vmem:[%s984_s1 + $0x30] sm:$0xff] (!%p164_p2)   ;;  %v785_v11 = vld [vmem:[%s985_s2 + $0x18] sm:$0xff] (!%p164_p2)   ;;  %v786_v13 = vld [vmem:[%s985_s2 + $0x20] sm:$0xff] (!%p164_p2)  }
   0x9   : > { %739 = vmatpush3.bf16.msra.mxu1 (!%p164_p2), %v782_v6  ;;  %v777_v12 = vld [vmem:[%s984_s1 + $0x38] sm:$0xff] (!%p164_p2)   ;;  %v787_v14 = vld [vmem:[%s985_s2 + $0x28] sm:$0xff] (!%p164_p2)   ;;  %v788_v17 = vld [vmem:[%s985_s2 + $0x30] sm:$0xff] (!%p164_p2)   ;;  %vm505_vm0 = vcmp.lt.s32.totalorder (!%p164_p2), %v504_v33, 8 }
   0xa   : > { %740 = vmatprep.subr.bf16.mxu1 (!%p164_p2), %v783_v7  ;;  %v789_v19 = vld [vmem:[%s985_s2 + $0x38] sm:$0xff] (!%p164_p2)   ;;  %v679_v34 = vld [vmem:[%s986_s3] ss:$0 sm:$0xff] (!%p164_p2) }
   0xb   : > { %717 = vmatpush3.bf16.msra.mxu0 (!%p164_p2), %v771_v1 }
   0xc   : > { %718 = vmatprep.subr.bf16.mxu0 (!%p164_p2), %v772_v2 }
   0xd   : > { %s989_s19 = smov (!%p190_p3, %s663_s19), 15  ;;  %741 = vmatpush3.bf16.msra.mxu1 %v783_v7 }
   0xe   : > { %s664_s24 = sshll.u32 %s989_s19, 2  ;;  %742 = vmatprep.subr.bf16.mxu1 %v784_v9  ;;  %s666_s6 = sshll.u32 %s989_s19, 3 }
   0xf   : > { %s878_s27 = scalar_lea.vmem %s983_s0, %s664_s24  ;;  %719 = vmatpush3.bf16.msra.mxu0 %v772_v2  ;;  %s962_s9 = scalar_lea.vmem %s987_s4, %s666_s6 }
  0x10   : > { %v778_v4 = vld [vmem:[%s878_s27] sm:$0xff]   ;;  %720 = vmatprep.subr.bf16.mxu0 %v773_v3  ;;  %v779_v15 = vld [vmem:[%s878_s27 + $0x8] sm:$0xff]   ;;  %v780_v16 = vld [vmem:[%s878_s27 + $0x10] sm:$0xff]  }
  0x11   : > { %730 = vmatprep.mubr.bf16.mxu0 %v778_v4  ;;  %743 = vmatpush3.bf16.msra.mxu1 %v784_v9  ;;  %v781_v18 = vld [vmem:[%s878_s27 + $0x18] sm:$0xff]  }
  0x12   : > { %744 = vmatprep.subr.bf16.mxu1 %v785_v11 }
  0x13   : > { %721 = vmatpush3.bf16.msra.mxu0 %v773_v3 }
  0x14   : > { %722 = vmatprep.subr.bf16.mxu0 %v774_v5 }
  0x15   : > { %745 = vmatpush3.bf16.msra.mxu1 %v785_v11 }
  0x16   : > { %746 = vmatprep.subr.bf16.mxu1 %v786_v13 }
  0x17   : > { %723 = vmatpush3.bf16.msra.mxu0 %v774_v5 }
  0x18   : > { %724 = vmatprep.subr.bf16.mxu0 %v775_v8 }
  0x19   : > { %747 = vmatpush3.bf16.msra.mxu1 %v786_v13 }
  0x1a   : > { %748 = vmatprep.subr.bf16.mxu1 %v787_v14 }
  0x1b   : > { %725 = vmatpush3.bf16.msra.mxu0 %v775_v8 }
  0x1c   : > { %726 = vmatprep.subr.bf16.mxu0 %v776_v10 }
  0x1d   : > { %749 = vmatpush3.bf16.msra.mxu1 %v787_v14 }
  0x1e   : > { %750 = vmatprep.subr.bf16.mxu1 %v788_v17 }
  0x1f   : > { %727 = vmatpush3.bf16.msra.mxu0 %v776_v10 }
  0x20   : > { %728 = vmatprep.subr.bf16.mxu0 %v777_v12 }
  0x21   : > { %751 = vmatpush3.bf16.msra.mxu1 %v788_v17 }
  0x22   : > { %752 = vmatprep.subr.bf16.mxu1 %v789_v19 }
  0x23   : > { %729 = vmatpush3.bf16.msra.mxu0 %v777_v12 }
  0x25   : > { %753 = vmatpush3.bf16.msra.mxu1 %v789_v19 }
  0x26   : > { %731 = vmatmul.mubr.bf16.vlgmr.msra.gmra.mrb[0].mxu0 %v779_v15 }
  0x27   : > { %734 = vmatprep.mubr.bf16.mxu0 %v780_v16 }
  0x2e   : > { %735 = vmatmul.mubr.bf16.gmra.mrb[4].mxu0 %v781_v18 }
  0xf9   : > { %v732_v20 = vpop.f32.mrb[0].mxu0 }
  0xfa   : > { %v332_v21 = vpop.f32.mrb[1].mxu0 }
  0xfb   : > { %v733_v22 = vpop.f32.mrb[2].mxu0 }
  0xfc   : > { %v364_v23 = vpack.c.bf16 %v733_v22, %v732_v20  ;;  %v335_v24 = vpop.f32.mrb[3].mxu0 }
  0xfd   : > { %v363_v25 = vpack.c.bf16 %v335_v24, %v332_v21 }
  0xff   : > { %754 = vmatprep.mubr.bf16.mxu1 %v363_v25 }
 0x100   : > { %755 = vmatmul.mubr.bf16.vlgmr.msra.gmra.mrb[0].mxu1 %v364_v23 }
 0x101   : > { %v736_v26 = vpop.f32.mrb[4].mxu0 }
 0x102   : > { %v348_v27 = vpop.f32.mrb[5].mxu0 }
 0x103   : > { %v737_v28 = vpop.f32.mrb[6].mxu0 }
 0x104   : > { %v366_v29 = vpack.c.bf16 %v737_v28, %v736_v26  ;;  %v351_v30 = vpop.f32.mrb[7].mxu0 }
 0x105   : > { %v365_v31 = vpack.c.bf16 %v351_v30, %v348_v27 }
 0x107   : > { %758 = vmatprep.mubr.bf16.mxu1 %v365_v31 }
 0x108   : > { %759 = vmatmul.mubr.bf16.gmra.mrb[4].mxu1 %v366_v29 }
 0x1d3   : > { %v756_v35 = vpop.f32.mrb[0].mxu1 }
 0x1d4   : > { %v481_v36 = vadd.f32 %v756_v35, %v679_v34  ;;  %v472_v37 = vpop.f32.mrb[1].mxu1 }
 0x1d5   : > { %v473_v38 = vadd.f32 %v679_v34, %v472_v37  ;;  %v757_v39 = vpop.f32.mrb[2].mxu1 }
 0x1d6   : > { %v484_v40 = vadd.f32 %v757_v39, %v679_v34  ;;  %v475_v41 = vpop.f32.mrb[3].mxu1  ;;  %v508_v42 = vsel %vm505_vm0, %v481_v36, -1e+30 }
 0x1d7   : > { %v476_v43 = vadd.f32 %v679_v34, %v475_v41  ;;  %518 = vmax.xlane.f32.xlu1 %v508_v42  ;;  %v506_v44 = vsel %vm505_vm0, %v473_v38, -1e+30 }
 0x1d8   : > { %514 = vmax.xlane.f32.xlu0 %v506_v44  ;;  %v509_v45 = vsel %vm505_vm0, %v484_v40, -1e+30 }
 0x1d9   : > { %v507_v47 = vsel %vm505_vm0, %v476_v43, -1e+30 }
 0x1db   : > { %520 = vmax.xlane.f32.xlu1 %v509_v45  ;;  %v760_v46 = vpop.f32.mrb[4].mxu1 }
 0x1dc   : > { %516 = vmax.xlane.f32.xlu0 %v507_v47  ;;  %v488_v48 = vpop.f32.mrb[5].mxu1  ;;  %v497_v52 = vadd.f32 %v760_v46, %v679_v34 }
 0x1dd   : > { %v489_v49 = vadd.f32 %v679_v34, %v488_v48  ;;  %v761_v50 = vpop.f32.mrb[6].mxu1 }
 0x1de   : > { %v491_v51 = vpop.f32.mrb[7].mxu1  ;;  %v500_v55 = vadd.f32 %v761_v50, %v679_v34  ;;  %v512_v57 = vsel %vm505_vm0, %v497_v52, -1e+30 }
 0x1df   : > { %v492_v53 = vadd.f32 %v679_v34, %v491_v51  ;;  %v510_v54 = vsel %vm505_vm0, %v489_v49, -1e+30 }
 0x1e0   : > { %522 = vmax.xlane.f32.xlu0 %v510_v54  ;;  %v513_v58 = vsel %vm505_vm0, %v500_v55, -1e+30 }
 0x1e1   : > { %v511_v56 = vsel %vm505_vm0, %v492_v53, -1e+30 }
 0x1e2   : > { %524 = vmax.xlane.f32.xlu1 %v511_v56 }
 0x1e4   : > { %526 = vmax.xlane.f32.xlu0 %v512_v57 }
 0x1e6   : > { %528 = vmax.xlane.f32.xlu1 %v513_v58 }
 0x264   : > { %v519_v59 = vpop.xlane.xlu1 %518 }
 0x265   : > { %v934_v60 = vsub.f32 %v508_v42, %v519_v59  ;;  %v515_v61 = vpop.xlane.xlu0 %514 }
 0x266   : > { %v936_v62 = vsub.f32 %v506_v44, %v515_v61 }
 0x267   : > { %v542_v63 = vmul.f32 1.442695, %v934_v60 }
 0x268   : > { %v538_v0 = vmul.f32 1.442695, %v936_v62  ;;  %v521_v1 = vpop.xlane.xlu1 %520 }
 0x269   : > { %790 = vpow2.f32 %v542_v63  ;;  %v940_v2 = vsub.f32 %v509_v45, %v521_v1  ;;  %v517_v3 = vpop.xlane.xlu0 %516 }
 0x26a   : > { %v942_v4 = vsub.f32 %v507_v47, %v517_v3  ;;  %792 = vpow2.f32 %v538_v0 }
 0x26b   : > { %v544_v5 = vmul.f32 1.442695, %v940_v2 }
 0x26c   : > { %v540_v6 = vmul.f32 1.442695, %v942_v4 }
 0x26d   : > { %794 = vpow2.f32 %v544_v5  ;;  %v523_v7 = vpop.xlane.xlu0 %522 }
 0x26e   : > { %v946_v8 = vsub.f32 %v510_v54, %v523_v7  ;;  %796 = vpow2.f32 %v540_v6 }
 0x26f   : > { %v525_v9 = vpop.xlane.xlu1 %524 }
 0x270   : > { %v546_v10 = vmul.f32 1.442695, %v946_v8  ;;  %v949_v11 = vsub.f32 %v511_v56, %v525_v9 }
 0x271   : > { %v527_v12 = vpop.xlane.xlu0 %526 }
 0x272   : > { %798 = vpow2.f32 %v546_v10  ;;  %v548_v13 = vmul.f32 1.442695, %v949_v11  ;;  %v952_v14 = vsub.f32 %v512_v57, %v527_v12 }
 0x273   : > { %v791_v15 = vpop.eup %790  ;;  %v529_v16 = vpop.xlane.xlu1 %528 }
 0x274   : > { %800 = vpow2.f32 %v548_v13  ;;  %v550_v17 = vmul.f32 1.442695, %v952_v14  ;;  %v955_v18 = vsub.f32 %v513_v58, %v529_v16  ;;  %558 = vadd.xlane.f32.xlu0 %v791_v15  ;;  %v793_v19 = vpop.eup %792 }
 0x276   : > { %802 = vpow2.f32 %v550_v17  ;;  %v552_v20 = vmul.f32 1.442695, %v955_v18 }
 0x277   : > { %v795_v21 = vpop.eup %794 }
 0x278   : > { %804 = vpow2.f32 %v552_v20  ;;  %560 = vadd.xlane.f32.xlu1 %v795_v21  ;;  %554 = vadd.xlane.f32.xlu0 %v793_v19  ;;  %v797_v22 = vpop.eup %796 }
 0x27c   : > { %v799_v23 = vpop.eup %798  ;;  %556 = vadd.xlane.f32.xlu1 %v797_v22 }
 0x27d   : > { %562 = vadd.xlane.f32.xlu0 %v799_v23 }
 0x27e   : > { %v801_v24 = vpop.eup %800 }
 0x280   : > { %v803_v25 = vpop.eup %802  ;;  %564 = vadd.xlane.f32.xlu1 %v801_v24 }
 0x281   : > { %566 = vadd.xlane.f32.xlu0 %v803_v25 }
 0x282   : > { %v805_v26 = vpop.eup %804 }
 0x284   : > { %568 = vadd.xlane.f32.xlu1 %v805_v26 }
 0x301   : > { %v559_v27 = vpop.xlane.xlu0 %558 }
 0x302   : > { %806 = vlog2.f32 %v559_v27 }
 0x305   : > { %v561_v28 = vpop.xlane.xlu1 %560  ;;  %v555_v29 = vpop.xlane.xlu0 %554 }
 0x306   : > { %808 = vlog2.f32 %v561_v28 }
 0x307   : > { %810 = vlog2.f32 %v555_v29 }
 0x309   : > { %v557_v30 = vpop.xlane.xlu1 %556 }
 0x30a   : > { %812 = vlog2.f32 %v557_v30  ;;  %v563_v31 = vpop.xlane.xlu0 %562 }
 0x30b   : > { %814 = vlog2.f32 %v563_v31 }
 0x30c   : > { %v807_v32 = vpop.eup %806 }
 0x30d   : > { %v575_v33 = vmul.f32 0.6931472, %v807_v32  ;;  %v565_v34 = vpop.xlane.xlu1 %564 }
 0x30e   : > { %816 = vlog2.f32 %v565_v34  ;;  %v567_v35 = vpop.xlane.xlu0 %566 }
 0x30f   : > { %v588_v36 = vsub.f32 %v934_v60, %v575_v33  ;;  %818 = vlog2.f32 %v567_v35 }
 0x310   : > { %v809_v37 = vpop.eup %808 }
 0x311   : > { %v811_v38 = vpop.eup %810  ;;  %596 = vst [vmem:[%s962_s9 + $0x10] sm:$0xff] %v588_v36  ;;  %v577_v39 = vmul.f32 0.6931472, %v809_v37  ;;  %v569_v40 = vpop.xlane.xlu1 %568 }
 0x312   : > { %v571_v41 = vmul.f32 0.6931472, %v811_v38  ;;  %820 = vlog2.f32 %v569_v40 }
 0x313   : > { %v589_v42 = vsub.f32 %v940_v2, %v577_v39 }
 0x314   : > { %v813_v43 = vpop.eup %812  ;;  %v586_v44 = vsub.f32 %v936_v62, %v571_v41 }
 0x315   : > { %v815_v45 = vpop.eup %814  ;;  %597 = vst [vmem:[%s962_s9 + $0x18] sm:$0xff] %v589_v42  ;;  %v573_v46 = vmul.f32 0.6931472, %v813_v43 }
 0x316   : > { %594 = vst [vmem:[%s962_s9] sm:$0xff] %v586_v44  ;;  %v579_v47 = vmul.f32 0.6931472, %v815_v45 }
 0x317   : > { %v587_v48 = vsub.f32 %v942_v4, %v573_v46 }
 0x318   : > { %v817_v49 = vpop.eup %816  ;;  %v590_v50 = vsub.f32 %v946_v8, %v579_v47 }
 0x319   : > { %v819_v51 = vpop.eup %818  ;;  %595 = vst [vmem:[%s962_s9 + $0x8] sm:$0xff] %v587_v48  ;;  %v581_v52 = vmul.f32 0.6931472, %v817_v49 }
 0x31a   : > { %598 = vst [vmem:[%s962_s9 + $0x20] sm:$0xff] %v590_v50  ;;  %v583_v53 = vmul.f32 0.6931472, %v819_v51 }
 0x31b   : > { %v591_v54 = vsub.f32 %v949_v11, %v581_v52 }
 0x31c   : > { %v821_v55 = vpop.eup %820  ;;  %v592_v56 = vsub.f32 %v952_v14, %v583_v53 }
 0x31d   : > { %599 = vst [vmem:[%s962_s9 + $0x28] sm:$0xff] %v591_v54  ;;  %v585_v57 = vmul.f32 0.6931472, %v821_v55 }
 0x31e   : > { %600 = vst [vmem:[%s962_s9 + $0x30] sm:$0xff] %v592_v56 }
 0x31f   : > { %v593_v58 = vsub.f32 %v955_v18, %v585_v57 }
 0x321   : > { %601 = vst [vmem:[%s962_s9 + $0x38] sm:$0xff] %v593_v58 }
 0x322 PF: > { %s14_s15 = sadd.s32 1, %s828_s15  }
 0x323   : > { %p11_p4 = scmp.ge.s32.totalorder %s14_s15, 4  }
 0x325   :  { %13 = sbr.rel (!%p11_p4) target bundleno = 1 (0x1), region = 66 }

// kernel: rgcn3norm_forward.4
= control target key start
LH: loop header
LB: loop body
LE: loop exit
PB: predicated region body
PF: predicated region fallthrough
CT: control target
= control target key end

     0   :  { %s1939_s27 = smov 0   ;;  %s2327_s0 = inlined_call_operand.vmem [shape: bf16[128,128], index: 0, kind: input, shape index: {}]   ;;  %s2328_s1 = inlined_call_operand.vmem [shape: bf16[128,128], index: 1, kind: input, shape index: {}]   ;;  %s2329_s2 = inlined_call_operand.vmem [shape: bf16[128,128], index: 2, kind: input, shape index: {}]   ;;  %s2330_s3 = inlined_call_operand.vmem [shape: f32[1,128], index: 3, kind: input, shape index: {}]   ;;  %s2331_s4 = inlined_call_operand.vmem [shape: f32[128,128], index: 4, kind: input, shape index: {}]   ;;  %s2332_s5 = inlined_call_operand.vmem [shape: f32[128,128], index: 5, kind: input, shape index: {}]   ;;  %s2333_s6 = inlined_call_operand.vmem [shape: f32[1,128], index: 6, kind: input, shape index: {}]   ;;  %s2334_s7 = inlined_call_operand.vmem [shape: f32[1,128], index: 7, kind: input, shape index: {}]   ;;  %s2335_s8 = inlined_call_operand.vmem [shape: bf16[128,128], index: 8, kind: output, shape index: {}]  }
   0x1 LB: > { %s1276_s28 = sadd.s32 4294967295, %s1892_s27   ;;  %p1280_p0 = scmp.ge.s32.totalorder %s1892_s27, 1  ;;  %s1892_s27 = sphi %s1939_s27, %s18_s27  }
   0x2   : > { %p263_p1 = scmp.lt.s32.totalorder %s1892_s27, 3 }
   0x4   : > { %p264_p2 = pnand %p1280_p0, %p263_p1 }
   0x5   : > { %v1850_v0 = vld [vmem:[%s2328_s1] sm:$0xff] (!%p264_p2)   ;;  %s1281_s9 = sshll.u32 (!%p264_p2), %s1276_s28, 3  ;;  %v1851_v1 = vld [vmem:[%s2328_s1 + $0x8] sm:$0xff] (!%p264_p2)   ;;  %v1852_v2 = vld [vmem:[%s2328_s1 + $0x10] sm:$0xff] (!%p264_p2)   ;;  %s1308_s21 = sshll.u32 (!%p264_p2), %s1276_s28, 6 }
   0x6   : > { %267 = sbr.rel (%p264_p2) target bundleno = 1374 (0x55e), region = 52  ;;  %p298_p3 = scmp.lt.s32.totalorder (!%p264_p2), %s1281_s9, 15  ;;  %1490 = vmatprep.subr.bf16.mxu0 (!%p264_p2), %v1850_v0  ;;  %v1853_v3 = vld [vmem:[%s2328_s1 + $0x18] sm:$0xff] (!%p264_p2)   ;;  %v1854_v5 = vld [vmem:[%s2328_s1 + $0x20] sm:$0xff] (!%p264_p2)   ;;  %v1863_v7 = vld [vmem:[%s2329_s2 + $0x8] sm:$0xff] (!%p264_p2)  }
   0x7   : > { %1491 = vmatpush3.bf16.msra.mxu0 (!%p264_p2), %v1850_v0  ;;  %v1862_v6 = vld [vmem:[%s2329_s2] sm:$0xff] (!%p264_p2)   ;;  %v1855_v8 = vld [vmem:[%s2328_s1 + $0x28] sm:$0xff] (!%p264_p2)   ;;  %v1864_v9 = vld [vmem:[%s2329_s2 + $0x10] sm:$0xff] (!%p264_p2)   ;;  %s1150_s22 = sshra.s32 (!%p264_p2), %s1308_s21, 3 }
   0x8   : > { %1492 = vmatprep.subr.bf16.mxu0 (!%p264_p2), %v1851_v1  ;;  %1514 = vmatprep.subr.bf16.mxu1 (!%p264_p2), %v1862_v6  ;;  %v1856_v10 = vld [vmem:[%s2328_s1 + $0x30] sm:$0xff] (!%p264_p2)   ;;  %v1865_v11 = vld [vmem:[%s2329_s2 + $0x18] sm:$0xff] (!%p264_p2)   ;;  %v1866_v13 = vld [vmem:[%s2329_s2 + $0x20] sm:$0xff] (!%p264_p2)   ;;  %s1309_s23 = sshll.u32 (!%p264_p2), %s1150_s22, 2 }
   0x9   : > { %1515 = vmatpush3.bf16.msra.mxu1 (!%p264_p2), %v1862_v6  ;;  %v1857_v12 = vld [vmem:[%s2328_s1 + $0x38] sm:$0xff] (!%p264_p2)   ;;  %v1867_v14 = vld [vmem:[%s2329_s2 + $0x28] sm:$0xff] (!%p264_p2)   ;;  %v1868_v17 = vld [vmem:[%s2329_s2 + $0x30] sm:$0xff] (!%p264_p2)   ;;  %s2293_s26 = scalar_lea.vmem (!%p264_p2), %s2328_s1, %s1309_s23 }
   0xa   : > { %1516 = vmatprep.subr.bf16.mxu1 (!%p264_p2), %v1863_v7  ;;  %v1869_v19 = vld [vmem:[%s2329_s2 + $0x38] sm:$0xff] (!%p264_p2)   ;;  %v619_v20 = vld [vmem:[%s2331_s4] sm:$0xff] (!%p264_p2)  ;;  %v620_v21 = vld [vmem:[%s2331_s4 + $0x8] sm:$0xff] (!%p264_p2) }
   0xb   : > { %1493 = vmatpush3.bf16.msra.mxu0 (!%p264_p2), %v1851_v1  ;;  %v621_v22 = vld [vmem:[%s2331_s4 + $0x10] sm:$0xff] (!%p264_p2)  ;;  %v2020_v23 = vpack.c.bf16 (!%p264_p2), %v620_v21, %v619_v20  ;;  %v622_v24 = vld [vmem:[%s2331_s4 + $0x18] sm:$0xff] (!%p264_p2)  ;;  %v623_v26 = vld [vmem:[%s2331_s4 + $0x20] sm:$0xff] (!%p264_p2) }
   0xc   : > { %1494 = vmatprep.subr.bf16.mxu0 (!%p264_p2), %v1852_v2  ;;  %v2025_v25 = vpack.c.bf16 (!%p264_p2), %v622_v24, %v621_v22  ;;  %v624_v27 = vld [vmem:[%s2331_s4 + $0x28] sm:$0xff] (!%p264_p2)  ;;  %v625_v29 = vld [vmem:[%s2331_s4 + $0x30] sm:$0xff] (!%p264_p2)  ;;  %v626_v30 = vld [vmem:[%s2331_s4 + $0x38] sm:$0xff] (!%p264_p2) }
   0xd   : > { %s2337_s9 = smov (!%p298_p3, %s1281_s9), 15  ;;  %1517 = vmatpush3.bf16.msra.mxu1 %v1863_v7  ;;  %v2036_v28 = vpack.c.bf16 %v624_v27, %v623_v26  ;;  %v2046_v31 = vpack.c.bf16 %v626_v30, %v625_v29  ;;  %v627_v32 = vld [vmem:[%s2331_s4 + $0x40] sm:$0xff]  ;;  %v628_v33 = vld [vmem:[%s2331_s4 + $0x48] sm:$0xff]  ;;  %v629_v35 = vld [vmem:[%s2331_s4 + $0x50] sm:$0xff] }
   0xe   : > { %s1282_s14 = sshll.u32 %s2337_s9, 2  ;;  %1518 = vmatprep.subr.bf16.mxu1 %v1864_v9  ;;  %v2056_v34 = vpack.c.bf16 %v628_v33, %v627_v32  ;;  %v630_v36 = vld [vmem:[%s2331_s4 + $0x58] sm:$0xff]  ;;  %v631_v50 = vld [vmem:[%s2331_s4 + $0x60] sm:$0xff]  ;;  %v632_v51 = vld [vmem:[%s2331_s4 + $0x68] sm:$0xff] }
   0xf   : > { %s1966_s17 = scalar_lea.vmem %s2327_s0, %s1282_s14  ;;  %1495 = vmatpush3.bf16.msra.mxu0 %v1852_v2  ;;  %v2066_v37 = vpack.c.bf16 %v630_v36, %v629_v35  ;;  %v2077_v52 = vpack.c.bf16 %v632_v51, %v631_v50  ;;  %v633_v53 = vld [vmem:[%s2331_s4 + $0x70] sm:$0xff]  ;;  %v634_v54 = vld [vmem:[%s2331_s4 + $0x78] sm:$0xff]  ;;  %v635_v56 = vld [vmem:[%s2332_s5] sm:$0xff]  ;;  %s2313_s13 = scalar_lea.vmem %s2335_s8, %s1282_s14 }
  0x10   : > { %v1858_v4 = vld [vmem:[%s1966_s17] sm:$0xff]   ;;  %1496 = vmatprep.subr.bf16.mxu0 %v1853_v3  ;;  %v1859_v15 = vld [vmem:[%s1966_s17 + $0x8] sm:$0xff]   ;;  %v1860_v16 = vld [vmem:[%s1966_s17 + $0x10] sm:$0xff]   ;;  %v2087_v55 = vpack.c.bf16 %v634_v54, %v633_v53 }
  0x11   : > { %1506 = vmatprep.mubr.bf16.mxu0 %v1858_v4  ;;  %1519 = vmatpush3.bf16.msra.mxu1 %v1864_v9  ;;  %v1861_v18 = vld [vmem:[%s1966_s17 + $0x18] sm:$0xff]   ;;  %v636_v57 = vld [vmem:[%s2332_s5 + $0x8] sm:$0xff]  ;;  %v637_v58 = vld [vmem:[%s2332_s5 + $0x10] sm:$0xff] }
  0x12   : > { %1520 = vmatprep.subr.bf16.mxu1 %v1865_v11  ;;  %v2101_v59 = vpack.c.bf16 %v636_v57, %v635_v56  ;;  %v638_v60 = vld [vmem:[%s2332_s5 + $0x18] sm:$0xff]  ;;  %v639_v62 = vld [vmem:[%s2332_s5 + $0x20] sm:$0xff]  ;;  %v640_v63 = vld [vmem:[%s2332_s5 + $0x28] sm:$0xff] }
  0x13   : > { %1497 = vmatpush3.bf16.msra.mxu0 %v1853_v3  ;;  %v2106_v61 = vpack.c.bf16 %v638_v60, %v637_v58  ;;  %v2117_v0 = vpack.c.bf16 %v640_v63, %v639_v62  ;;  %v641_v1 = vld [vmem:[%s2332_s5 + $0x30] sm:$0xff]  ;;  %v642_v2 = vld [vmem:[%s2332_s5 + $0x38] sm:$0xff]  ;;  %v643_v4 = vld [vmem:[%s2332_s5 + $0x40] sm:$0xff] }
  0x14   : > { %1498 = vmatprep.subr.bf16.mxu0 %v1854_v5  ;;  %v2127_v3 = vpack.c.bf16 %v642_v2, %v641_v1  ;;  %v645_v7 = vld [vmem:[%s2332_s5 + $0x50] sm:$0xff] }
  0x15   : > { %1521 = vmatpush3.bf16.msra.mxu1 %v1865_v11  ;;  %v648_v11 = vld [vmem:[%s2332_s5 + $0x68] sm:$0xff] }
  0x16   : > { %1522 = vmatprep.subr.bf16.mxu1 %v1866_v13 }
  0x17   : > { %1499 = vmatpush3.bf16.msra.mxu0 %v1854_v5  ;;  %v644_v5 = vld [vmem:[%s2332_s5 + $0x48] sm:$0xff] }
  0x18   : > { %1500 = vmatprep.subr.bf16.mxu0 %v1855_v8  ;;  %v2137_v6 = vpack.c.bf16 %v644_v5, %v643_v4 }
  0x19   : > { %1523 = vmatpush3.bf16.msra.mxu1 %v1866_v13  ;;  %v1297_v13 = vld [vmem:[%s2330_s3] ss:$0 sm:$0xff] }
  0x1a   : > { %1524 = vmatprep.subr.bf16.mxu1 %v1867_v14 }
  0x1b   : > { %1501 = vmatpush3.bf16.msra.mxu0 %v1855_v8  ;;  %v646_v8 = vld [vmem:[%s2332_s5 + $0x58] sm:$0xff] }
  0x1c   : > { %1502 = vmatprep.subr.bf16.mxu0 %v1856_v10  ;;  %v2147_v9 = vpack.c.bf16 %v646_v8, %v645_v7 }
  0x1d   : > { %1525 = vmatpush3.bf16.msra.mxu1 %v1867_v14 }
  0x1e   : > { %1526 = vmatprep.subr.bf16.mxu1 %v1868_v17 }
  0x1f   : > { %1503 = vmatpush3.bf16.msra.mxu0 %v1856_v10  ;;  %v647_v10 = vld [vmem:[%s2332_s5 + $0x60] sm:$0xff] }
  0x20   : > { %1504 = vmatprep.subr.bf16.mxu0 %v1857_v12 }
  0x21   : > { %1527 = vmatpush3.bf16.msra.mxu1 %v1868_v17 }
  0x22   : > { %1528 = vmatprep.subr.bf16.mxu1 %v1869_v19 }
  0x23   : > { %1505 = vmatpush3.bf16.msra.mxu0 %v1857_v12  ;;  %v2157_v12 = vpack.c.bf16 %v648_v11, %v647_v10 }
  0x24   : > { %1715 = vmatprep.subr.bf16.mxu0 %v2020_v23 }
  0x25   : > { %1529 = vmatpush3.bf16.msra.mxu1 %v1869_v19 }
  0x26   : > { %1507 = vmatmul.mubr.bf16.vlgmr.msra.gmra.mrb[0].mxu0 %v1859_v15  ;;  %1747 = vmatprep.subr.bf16.mxu1 %v2101_v59 }
  0x27   : > { %1510 = vmatprep.mubr.bf16.mxu0 %v1860_v16  ;;  %1717 = vmatpush3.bf16.msra.mxu0 %v2020_v23 }
  0x28   : > { %1719 = vmatprep.subr.bf16.mxu0 %v2025_v25 }
  0x2b   : > { %1721 = vmatpush3.bf16.msra.mxu0 %v2025_v25 }
  0x2c   : > { %1723 = vmatprep.subr.bf16.mxu0 %v2036_v28 }
  0x2e   : > { %1511 = vmatmul.mubr.bf16.gmra.mrb[4].mxu0 %v1861_v18 }
  0x2f   : > { %1725 = vmatpush3.bf16.msra.mxu0 %v2036_v28 }
  0x30   : > { %1727 = vmatprep.subr.bf16.mxu0 %v2046_v31 }
  0x33   : > { %1729 = vmatpush3.bf16.msra.mxu0 %v2046_v31 }
  0x34   : > { %1731 = vmatprep.subr.bf16.mxu0 %v2056_v34 }
  0x37   : > { %1733 = vmatpush3.bf16.msra.mxu0 %v2056_v34 }
  0x38   : > { %1735 = vmatprep.subr.bf16.mxu0 %v2066_v37 }
  0x3b   : > { %1737 = vmatpush3.bf16.msra.mxu0 %v2066_v37 }
  0x3c   : > { %1739 = vmatprep.subr.bf16.mxu0 %v2077_v52 }
  0x3f   : > { %1741 = vmatpush3.bf16.msra.mxu0 %v2077_v52 }
  0x40   : > { %1743 = vmatprep.subr.bf16.mxu0 %v2087_v55 }
  0x43   : > { %1745 = vmatpush3.bf16.msra.mxu0 %v2087_v55 }
  0x44   : > { %1779 = vmatprep.subr.bf16.mxu0 %v2020_v23 }
  0xf9   : > { %v1508_v38 = vpop.f32.mrb[0].mxu0 }
  0xfa   : > { %v440_v39 = vpop.f32.mrb[1].mxu0 }
  0xfb   : > { %v1509_v40 = vpop.f32.mrb[2].mxu0 }
  0xfc   : > { %v472_v41 = vpack.c.bf16 %v1509_v40, %v1508_v38  ;;  %v443_v42 = vpop.f32.mrb[3].mxu0 }
  0xfd   : > { %v471_v43 = vpack.c.bf16 %v443_v42, %v440_v39 }
  0xff   : > { %1530 = vmatprep.mubr.bf16.mxu1 %v471_v43 }
 0x100   : > { %1531 = vmatmul.mubr.bf16.vlgmr.msra.gmra.mrb[0].mxu1 %v472_v41 }
 0x101   : > { %v1512_v44 = vpop.f32.mrb[4].mxu0  ;;  %1749 = vmatpush3.bf16.msra.mxu1 %v2101_v59 }
 0x102   : > { %v456_v45 = vpop.f32.mrb[5].mxu0  ;;  %1751 = vmatprep.subr.bf16.mxu1 %v2106_v61 }
 0x103   : > { %v1513_v46 = vpop.f32.mrb[6].mxu0 }
 0x104   : > { %v474_v47 = vpack.c.bf16 %v1513_v46, %v1512_v44  ;;  %v459_v48 = vpop.f32.mrb[7].mxu0 }
 0x105   : > { %v473_v49 = vpack.c.bf16 %v459_v48, %v456_v45  ;;  %1753 = vmatpush3.bf16.msra.mxu1 %v2106_v61 }
 0x106   : > { %1755 = vmatprep.subr.bf16.mxu1 %v2117_v0 }
 0x107   : > { %1534 = vmatprep.mubr.bf16.mxu1 %v473_v49 }
 0x108   : > { %1535 = vmatmul.mubr.bf16.gmra.mrb[4].mxu1 %v474_v47 }
 0x109   : > { %1757 = vmatpush3.bf16.msra.mxu1 %v2117_v0 }
 0x10a   : > { %1759 = vmatprep.subr.bf16.mxu1 %v2127_v3 }
 0x10d   : > { %1761 = vmatpush3.bf16.msra.mxu1 %v2127_v3 }
 0x10e   : > { %1763 = vmatprep.subr.bf16.mxu1 %v2137_v6 }
 0x111   : > { %1765 = vmatpush3.bf16.msra.mxu1 %v2137_v6 }
 0x112   : > { %1767 = vmatprep.subr.bf16.mxu1 %v2147_v9 }
 0x115   : > { %1769 = vmatpush3.bf16.msra.mxu1 %v2147_v9 }
 0x116   : > { %1771 = vmatprep.subr.bf16.mxu1 %v2157_v12 }
 0x119   : > { %1773 = vmatpush3.bf16.msra.mxu1 %v2157_v12 }
 0x1d3   : > { %v1532_v14 = vpop.f32.mrb[0].mxu1 }
 0x1d4   : > { %v580_v15 = vpop.f32.mrb[1].mxu1  ;;  %v2167_v18 = vadd.f32 %v1532_v14, %v1297_v13 }
 0x1d5   : > { %v2165_v16 = vadd.f32 %v1297_v13, %v580_v15  ;;  %v1533_v17 = vpop.f32.mrb[2].mxu1 }
 0x1d6   : > { %v583_v19 = vpop.f32.mrb[3].mxu1  ;;  %v2172_v22 = vadd.f32 %v1533_v17, %v1297_v13  ;;  %v613_v26 = vmax.f32 %v2167_v18, 0.0 }
 0x1d7   : > { %v611_v20 = vmax.f32 %v2165_v16, 0.0  ;;  %v2170_v21 = vadd.f32 %v1297_v13, %v583_v19 }
 0x1d8   : > { %v614_v30 = vmax.f32 %v2172_v22, 0.0 }
 0x1d9   : > { %v612_v24 = vmax.f32 %v2170_v21, 0.0  ;;  %1570 = vmatprep.mubr.f32.mxu0 %v611_v20 }
 0x1db   : > { %v1536_v27 = vpop.f32.mrb[4].mxu1  ;;  %1571 = vmatmul.mubr.f32.vlgmr.msra.gmra.mrb[8].mxu0 %v612_v24 }
 0x1dc   : > { %v596_v29 = vpop.f32.mrb[5].mxu1  ;;  %1573 = vmatprep.mubr.f32.mxu0 %v613_v26  ;;  %1781 = vmatpush3.bf16.msra.mxu0 %v2020_v23  ;;  %v2187_v35 = vadd.f32 %v1536_v27, %v1297_v13 }
 0x1dd   : > { %v2184_v32 = vadd.f32 %v1297_v13, %v596_v29  ;;  %v1537_v33 = vpop.f32.mrb[6].mxu1  ;;  %1783 = vmatprep.subr.bf16.mxu0 %v2025_v25 }
 0x1de   : > { %v599_v36 = vpop.f32.mrb[7].mxu1  ;;  %v2195_v23 = vadd.f32 %v1537_v33, %v1297_v13  ;;  %v617_v41 = vmax.f32 %v2187_v35, 0.0 }
 0x1df   : > { %v615_v38 = vmax.f32 %v2184_v32, 0.0  ;;  %v2190_v39 = vadd.f32 %v1297_v13, %v599_v36  ;;  %1574 = vmatmul.mubr.f32.gmra.mrb[10].mxu0 %v614_v30 }
 0x1e0   : > { %1785 = vmatpush3.bf16.msra.mxu0 %v2025_v25  ;;  %v618_v25 = vmax.f32 %v2195_v23, 0.0 }
 0x1e1   : > { %v616_v40 = vmax.f32 %v2190_v39, 0.0  ;;  %1576 = vmatprep.mubr.f32.mxu0 %v615_v38  ;;  %1787 = vmatprep.subr.bf16.mxu0 %v2036_v28 }
 0x1e3   : > { %1577 = vmatmul.mubr.f32.gmra.mrb[12].mxu0 %v616_v40 }
 0x1e4   : > { %1579 = vmatprep.mubr.f32.mxu0 %v617_v41  ;;  %1789 = vmatpush3.bf16.msra.mxu0 %v2036_v28  ;;  %v649_v28 = vld [vmem:[%s2332_s5 + $0x70] sm:$0xff] }
 0x1e5   : > { %1791 = vmatprep.subr.bf16.mxu0 %v2046_v31 }
 0x1e7   : > { %1580 = vmatmul.mubr.f32.gmra.mrb[14].mxu0 %v618_v25 }
 0x1e8   : > { %1793 = vmatpush3.bf16.msra.mxu0 %v2046_v31  ;;  %v650_v31 = vld [vmem:[%s2332_s5 + $0x78] sm:$0xff] }
 0x1e9   : > { %1795 = vmatprep.subr.bf16.mxu0 %v2056_v34 }
 0x1ec   : > { %1797 = vmatpush3.bf16.msra.mxu0 %v2056_v34  ;;  %v1774_v34 = vpack.c.bf16 %v650_v31, %v649_v28 }
 0x1ed   : > { %1799 = vmatprep.subr.bf16.mxu0 %v2066_v37 }
 0x1ee   : > { %1775 = vmatprep.subr.bf16.mxu1 %v1774_v34 }
 0x1ef   : > { %1777 = vmatpush3.bf16.msra.mxu1 %v1774_v34 }
 0x1f0   : > { %1801 = vmatpush3.bf16.msra.mxu0 %v2066_v37  ;;  %1811 = vmatprep.subr.bf16.mxu1 %v2101_v59 }
 0x1f1   : > { %1803 = vmatprep.subr.bf16.mxu0 %v2077_v52 }
 0x1f4   : > { %1805 = vmatpush3.bf16.msra.mxu0 %v2077_v52 }
 0x1f5   : > { %1807 = vmatprep.subr.bf16.mxu0 %v2087_v55 }
 0x1f8   : > { %1809 = vmatpush3.bf16.msra.mxu0 %v2087_v55 }
 0x2ae   : > { %v1572_v37 = vpop.f32.mrb[8].mxu0 }
 0x2af   : > { %v717_v42 = vpop.f32.mrb[9].mxu0  ;;  %v757_v44 = vmul.f32 0.5, %v1572_v37 }
 0x2b0   : > { %v756_v43 = vmul.f32 0.5, %v717_v42 }
 0x2b2   : > { %v1575_v45 = vpop.f32.mrb[10].mxu0  ;;  %1614 = vmatprep.mubr.f32.mxu1 %v756_v43 }
 0x2b3   : > { %v727_v46 = vpop.f32.mrb[11].mxu0  ;;  %1615 = vmatmul.mubr.f32.vlgmr.msra.gmra.mrb[8].mxu1 %v757_v44  ;;  %v759_v48 = vmul.f32 0.5, %v1575_v45 }
 0x2b4   : > { %v758_v47 = vmul.f32 0.5, %v727_v46  ;;  %1813 = vmatpush3.bf16.msra.mxu1 %v2101_v59 }
 0x2b5   : > { %1815 = vmatprep.subr.bf16.mxu1 %v2106_v61 }
 0x2b6   : > { %v1578_v49 = vpop.f32.mrb[12].mxu0  ;;  %1617 = vmatprep.mubr.f32.mxu1 %v758_v47  ;;  %v1306_v47 = vld [vmem:[%s2333_s6] ss:$0 sm:$0xff] }
 0x2b7   : > { %v737_v50 = vpop.f32.mrb[13].mxu0  ;;  %1618 = vmatmul.mubr.f32.gmra.mrb[10].mxu1 %v759_v48  ;;  %v761_v52 = vmul.f32 0.5, %v1578_v49  ;;  %v1329_v48 = vld [vmem:[%s2293_s26] sm:$0xff]  }
 0x2b8   : > { %v760_v51 = vmul.f32 0.5, %v737_v50  ;;  %1817 = vmatpush3.bf16.msra.mxu1 %v2106_v61 }
 0x2b9   : > { %1819 = vmatprep.subr.bf16.mxu1 %v2117_v0 }
 0x2ba   : > { %v1581_v53 = vpop.f32.mrb[14].mxu0  ;;  %1620 = vmatprep.mubr.f32.mxu1 %v760_v51 }
 0x2bb   : > { %v747_v54 = vpop.f32.mrb[15].mxu0  ;;  %1621 = vmatmul.mubr.f32.gmra.mrb[12].mxu1 %v761_v52  ;;  %v763_v56 = vmul.f32 0.5, %v1581_v53 }
 0x2bc   : > { %v762_v55 = vmul.f32 0.5, %v747_v54  ;;  %1821 = vmatpush3.bf16.msra.mxu1 %v2117_v0  ;;  %v1307_v54 = vld [vmem:[%s2334_s7] ss:$0 sm:$0xff] }
 0x2bd   : > { %1823 = vmatprep.subr.bf16.mxu1 %v2127_v3 }
 0x2be   : > { %1623 = vmatprep.mubr.f32.mxu1 %v762_v55 }
 0x2bf   : > { %1624 = vmatmul.mubr.f32.gmra.mrb[14].mxu1 %v763_v56 }
 0x2c0   : > { %1825 = vmatpush3.bf16.msra.mxu1 %v2127_v3 }
 0x2c1   : > { %1827 = vmatprep.subr.bf16.mxu1 %v2137_v6 }
 0x2c4   : > { %1829 = vmatpush3.bf16.msra.mxu1 %v2137_v6 }
 0x2c5   : > { %1831 = vmatprep.subr.bf16.mxu1 %v2147_v9 }
 0x2c8   : > { %1833 = vmatpush3.bf16.msra.mxu1 %v2147_v9 }
 0x2c9   : > { %1835 = vmatprep.subr.bf16.mxu1 %v2157_v12 }
 0x2cc   : > { %1837 = vmatpush3.bf16.msra.mxu1 %v2157_v12 }
 0x2cd   : > { %1839 = vmatprep.subr.bf16.mxu1 %v1774_v34 }
 0x2d0   : > { %1841 = vmatpush3.bf16.msra.mxu1 %v1774_v34 }
 0x386   : > { %v1616_v57 = vpop.f32.mrb[8].mxu1 }
 0x387   : > { %v2242_v58 = vsub.f32 %v612_v24, %v1616_v57  ;;  %v830_v59 = vpop.f32.mrb[9].mxu1  ;;  %v1331_v57 = vunpack.c.h.bf16 %v1329_v48 }
 0x388   : > { %v2246_v60 = vsub.f32 %v611_v20, %v830_v59 }
 0x389   : > { %v878_v63 = vmul.f32 %v2242_v58, %v2242_v58 }
 0x38a   : > { %v877_v61 = vmul.f32 %v2246_v60, %v2246_v60  ;;  %v1619_v62 = vpop.f32.mrb[10].mxu1 }
 0x38b   : > { %v2254_v0 = vsub.f32 %v614_v30, %v1619_v62  ;;  %v840_v1 = vpop.f32.mrb[11].mxu1  ;;  %v1330_v62 = vunpack.c.l.bf16 %v1329_v48 }
 0x38c   : > { %v2258_v2 = vsub.f32 %v613_v26, %v840_v1  ;;  %1658 = vmatprep.mubr.f32.mxu0 %v877_v61 }
 0x38d   : > { %1659 = vmatmul.mubr.f32.vlgmr.msra.gmra.mrb[16].mxu0 %v878_v63  ;;  %v880_v5 = vmul.f32 %v2254_v0, %v2254_v0  ;;  %v1364_v63 = vld [vmem:[%s2293_s26 + $0x8] sm:$0xff]  }
 0x38e   : > { %v879_v3 = vmul.f32 %v2258_v2, %v2258_v2  ;;  %v1622_v4 = vpop.f32.mrb[12].mxu1 }
 0x38f   : > { %v2266_v6 = vsub.f32 %v616_v40, %v1622_v4  ;;  %v850_v7 = vpop.f32.mrb[13].mxu1 }
 0x390   : > { %v2270_v8 = vsub.f32 %v615_v38, %v850_v7  ;;  %1661 = vmatprep.mubr.f32.mxu0 %v879_v3 }
 0x391   : > { %1662 = vmatmul.mubr.f32.gmra.mrb[18].mxu0 %v880_v5  ;;  %v882_v11 = vmul.f32 %v2266_v6, %v2266_v6 }
 0x392   : > { %v881_v9 = vmul.f32 %v2270_v8, %v2270_v8  ;;  %v1625_v10 = vpop.f32.mrb[14].mxu1 }
 0x393   : > { %v2278_v12 = vsub.f32 %v618_v25, %v1625_v10  ;;  %v860_v13 = vpop.f32.mrb[15].mxu1 }
 0x394   : > { %v2282_v14 = vsub.f32 %v617_v41, %v860_v13  ;;  %1664 = vmatprep.mubr.f32.mxu0 %v881_v9 }
 0x395   : > { %1665 = vmatmul.mubr.f32.gmra.mrb[20].mxu0 %v882_v11  ;;  %v884_v16 = vmul.f32 %v2278_v12, %v2278_v12 }
 0x396   : > { %v883_v15 = vmul.f32 %v2282_v14, %v2282_v14 }
 0x398   : > { %1667 = vmatprep.mubr.f32.mxu0 %v883_v15  ;;  %v1334_v15 = vunpack.c.l.bf16 %v1364_v63 }
 0x399   : > { %1668 = vmatmul.mubr.f32.gmra.mrb[22].mxu0 %v884_v16  ;;  %v1365_v16 = vld [vmem:[%s2293_s26 + $0x10] sm:$0xff]  }
 0x460   : > { %v1660_v17 = vpop.f32.mrb[16].mxu0 }
 0x461   : > { %v951_v18 = vpop.f32.mrb[17].mxu0  ;;  %v991_v20 = vmul.f32 0.5, %v1660_v17 }
 0x462   : > { %v990_v19 = vmul.f32 0.5, %v951_v18 }
 0x464   : > { %v1663_v21 = vpop.f32.mrb[18].mxu0  ;;  %1702 = vmatprep.mubr.f32.mxu1 %v990_v19 }
 0x465   : > { %v961_v22 = vpop.f32.mrb[19].mxu0  ;;  %1703 = vmatmul.mubr.f32.vlgmr.msra.gmra.mrb[16].mxu1 %v991_v20  ;;  %v993_v26 = vmul.f32 0.5, %v1663_v21 }
 0x466   : > { %v992_v24 = vmul.f32 0.5, %v961_v22 }
 0x468   : > { %v1666_v27 = vpop.f32.mrb[20].mxu0  ;;  %1705 = vmatprep.mubr.f32.mxu1 %v992_v24  ;;  %v1339_v24 = vunpack.c.h.bf16 %v1365_v16 }
 0x469   : > { %v971_v29 = vpop.f32.mrb[21].mxu0  ;;  %1706 = vmatmul.mubr.f32.gmra.mrb[18].mxu1 %v993_v26  ;;  %v995_v32 = vmul.f32 0.5, %v1666_v27 }
 0x46a   : > { %v994_v30 = vmul.f32 0.5, %v971_v29 }
 0x46c   : > { %v1669_v33 = vpop.f32.mrb[22].mxu0  ;;  %1708 = vmatprep.mubr.f32.mxu1 %v994_v30  ;;  %v1338_v30 = vunpack.c.l.bf16 %v1365_v16 }
 0x46d   : > { %v981_v35 = vpop.f32.mrb[23].mxu0  ;;  %1709 = vmatmul.mubr.f32.gmra.mrb[20].mxu1 %v995_v32  ;;  %v997_v38 = vmul.f32 0.5, %v1669_v33  ;;  %v1366_v32 = vld [vmem:[%s2293_s26 + $0x18] sm:$0xff]  }
 0x46e   : > { %v996_v36 = vmul.f32 0.5, %v981_v35 }
 0x470   : > { %1711 = vmatprep.mubr.f32.mxu1 %v996_v36 }
 0x471   : > { %1712 = vmatmul.mubr.f32.gmra.mrb[22].mxu1 %v997_v38 }
 0x538   : > { %v1704_v39 = vpop.f32.mrb[16].mxu1 }
 0x539   : > { %v1070_v23 = vadd.f32 1e-05, %v1704_v39  ;;  %v1064_v40 = vpop.f32.mrb[17].mxu1 }
 0x53a   : > { %v1065_v41 = vadd.f32 1e-05, %v1064_v40  ;;  %v1343_v40 = vunpack.c.h.bf16 %v1366_v32 }
 0x53b   : > { %1870 = vrsqrt.f32 %v1070_v23 }
 0x53c   : > { %1872 = vrsqrt.f32 %v1065_v41  ;;  %v1707_v25 = vpop.f32.mrb[18].mxu1 }
 0x53d   : > { %v1080_v28 = vadd.f32 1e-05, %v1707_v25  ;;  %v1074_v31 = vpop.f32.mrb[19].mxu1 }
 0x53e   : > { %v1075_v34 = vadd.f32 1e-05, %v1074_v31 }
 0x53f   : > { %1874 = vrsqrt.f32 %v1080_v28  ;;  %v1342_v28 = vunpack.c.l.bf16 %v1366_v32 }
 0x540   : > { %1876 = vrsqrt.f32 %v1075_v34  ;;  %v1710_v37 = vpop.f32.mrb[20].mxu1 }
 0x541   : > { %v1090_v42 = vadd.f32 1e-05, %v1710_v37  ;;  %v1084_v43 = vpop.f32.mrb[21].mxu1 }
 0x542   : > { %v1085_v44 = vadd.f32 1e-05, %v1084_v43 }
 0x543   : > { %1878 = vrsqrt.f32 %v1090_v42 }
 0x544   : > { %1880 = vrsqrt.f32 %v1085_v44  ;;  %v1713_v45 = vpop.f32.mrb[22].mxu1 }
 0x545   : > { %v1871_v46 = vpop.eup %1870  ;;  %v1100_v49 = vadd.f32 1e-05, %v1713_v45  ;;  %v1094_v50 = vpop.f32.mrb[23].mxu1 }
 0x546   : > { %v1873_v51 = vpop.eup %1872  ;;  %v1112_v52 = vmul.f32 %v1871_v46, %v2242_v58  ;;  %v1095_v53 = vadd.f32 1e-05, %v1094_v50 }
 0x547   : > { %v1111_v55 = vmul.f32 %v1873_v51, %v2246_v60  ;;  %1882 = vrsqrt.f32 %v1100_v49  ;;  %v1335_v60 = vunpack.c.h.bf16 %v1364_v63 }
 0x548   : > { %v1127_v56 = vmul.f32 %v1306_v47, %v1112_v52  ;;  %1884 = vrsqrt.f32 %v1095_v53 }
 0x549   : > { %v1875_v59 = vpop.eup %1874  ;;  %v1126_v61 = vmul.f32 %v1306_v47, %v1111_v55 }
 0x54a   : > { %v1877_v1 = vpop.eup %1876  ;;  %v1142_v3 = vadd.f32 %v1307_v54, %v1127_v56  ;;  %v1114_v58 = vmul.f32 %v1875_v59, %v2254_v0 }
 0x54b   : > { %v1141_v4 = vadd.f32 %v1307_v54, %v1126_v61  ;;  %v1113_v5 = vmul.f32 %v1877_v1, %v2258_v2 }
 0x54c   : > { %v1171_v7 = vadd.f32 %v1331_v57, %v1142_v3  ;;  %v1129_v9 = vmul.f32 %v1306_v47, %v1114_v58 }
 0x54d   : > { %v1879_v10 = vpop.eup %1878  ;;  %v1170_v11 = vadd.f32 %v1330_v62, %v1141_v4  ;;  %v1128_v13 = vmul.f32 %v1306_v47, %v1113_v5 }
 0x54e   : > { %v1881_v17 = vpop.eup %1880  ;;  %v1144_v0 = vadd.f32 %v1307_v54, %v1129_v9  ;;  %v1116_v2 = vmul.f32 %v1879_v10, %v2266_v6 }
 0x54f   : > { %v1347_v18 = vpack.c.bf16 %v1171_v7, %v1170_v11  ;;  %v1143_v19 = vadd.f32 %v1307_v54, %v1128_v13  ;;  %v1115_v20 = vmul.f32 %v1881_v17, %v2270_v8 }
 0x550   : > { %v1173_v21 = vadd.f32 %v1335_v60, %v1144_v0  ;;  %v1131_v22 = vmul.f32 %v1306_v47, %v1116_v2 }
 0x551   : > { %v1883_v26 = vpop.eup %1882  ;;  %1348 = vst [vmem:[%s2313_s13] sm:$0xff] %v1347_v18   ;;  %v1172_v27 = vadd.f32 %v1334_v15, %v1143_v19  ;;  %v1130_v29 = vmul.f32 %v1306_v47, %v1115_v20 }
 0x552   : > { %v1885_v33 = vpop.eup %1884  ;;  %v1146_v35 = vadd.f32 %v1307_v54, %v1131_v22  ;;  %v1118_v36 = vmul.f32 %v1883_v26, %v2278_v12 }
 0x553   : > { %v1352_v6 = vpack.c.bf16 %v1173_v21, %v1172_v27  ;;  %v1145_v38 = vadd.f32 %v1307_v54, %v1130_v29  ;;  %v1117_v8 = vmul.f32 %v1885_v33, %v2282_v14 }
 0x554   : > { %v1175_v39 = vadd.f32 %v1339_v24, %v1146_v35  ;;  %v1133_v23 = vmul.f32 %v1306_v47, %v1118_v36 }
 0x555   : > { %1367 = vst [vmem:[%s2313_s13 + $0x8] sm:$0xff] %v1352_v6   ;;  %v1174_v41 = vadd.f32 %v1338_v30, %v1145_v38  ;;  %v1132_v25 = vmul.f32 %v1306_v47, %v1117_v8 }
 0x556   : > { %v1148_v31 = vadd.f32 %v1307_v54, %v1133_v23 }
 0x557   : > { %v1357_v34 = vpack.c.bf16 %v1175_v39, %v1174_v41  ;;  %v1147_v37 = vadd.f32 %v1307_v54, %v1132_v25 }
 0x558   : > { %v1177_v42 = vadd.f32 %v1343_v40, %v1148_v31 }
 0x559   : > { %1368 = vst [vmem:[%s2313_s13 + $0x10] sm:$0xff] %v1357_v34   ;;  %v1176_v43 = vadd.f32 %v1342_v28, %v1147_v37 }
 0x55b   : > { %v1362_v44 = vpack.c.bf16 %v1177_v42, %v1176_v43 }
 0x55d   : > { %1369 = vst [vmem:[%s2313_s13 + $0x18] sm:$0xff] %v1362_v44  }
 0x55e PF: > { %s18_s27 = sadd.s32 1, %s1892_s27  }
 0x55f   : > { %p15_p4 = scmp.ge.s32.totalorder %s18_s27, 4  }
 0x561   :  { %17 = sbr.rel (!%p15_p4) target bundleno = 1 (0x1), region = 83 }

</bundles_post_ra>
